<compile_context>
chip_gen: v5e
topology: v5e:2x2
jax: 0.10.0
libtpu: 0.0.40
codegen_flags: <defaults>
</compile_context>

<pallas_src>
import math
import functools

import numpy as np
import jax
import jax.numpy as jnp
from jax.experimental import pallas as pl
from jax.experimental.pallas import tpu as pltpu


# ----------------------------- fused Pallas kernel ------------------------------

def _fused_forward_kernel(lens_ref,
                          x_ref, w_in_ref, b_in_ref, pe_ref,
                          wqkv_ref, bqkv_ref, wo_ref, bo_ref,
                          ln1w_ref, ln1b_ref, w1_ref, b1_ref,
                          w2_ref, b2_ref, ln2w_ref, ln2b_ref,
                          w_out_ref, b_out_ref,
                          o_ref, *, nhead, num_layers):
    B, S, F = x_ref.shape
    D = w_in_ref.shape[1]
    hd = D // nhead
    scale = 1.0 / math.sqrt(hd)
    BS = B * S

    # ---- key-padding bias (B,1,S) and last-token one-hot (B,B*S) from SMEM lens ----
    col3 = jax.lax.broadcasted_iota(jnp.int32, (B, 1, S), 2)
    brow3 = jax.lax.broadcasted_iota(jnp.int32, (B, 1, S), 0)
    lens_b = jnp.zeros((B, 1, S), jnp.int32)
    for b in range(B):
        lens_b = jnp.where(brow3 == b, lens_ref[b], lens_b)
    bias = jnp.where(col3 < lens_b, 0.0, -1e9).astype(jnp.float32)      # (B,1,S)

    colf = jax.lax.broadcasted_iota(jnp.int32, (B, BS), 1)
    rowb = jax.lax.broadcasted_iota(jnp.int32, (B, BS), 0)
    tgt = jnp.zeros((B, BS), jnp.int32)
    for b in range(B):
        tgt = jnp.where(rowb == b, b * S + lens_ref[b] - 1, tgt)
    onehot_last = jnp.where(colf == tgt, 1.0, 0.0).astype(jnp.float32)  # (B,B*S)

    def layer_norm(y, w, b):
        mu = jnp.mean(y, axis=-1, keepdims=True)
        var = jnp.mean((y - mu) ** 2, axis=-1, keepdims=True)
        return (y - mu) * jax.lax.rsqrt(var + 1e-5) * w + b

    # ---- 1) input projection + positional encoding on a (B*S, D) slab ----
    x2 = x_ref[...].reshape(BS, F)
    h2 = jnp.dot(x2, w_in_ref[...], preferred_element_type=jnp.float32) + b_in_ref[...]
    pe2 = jnp.concatenate([pe_ref[...]] * B, axis=0)                    # (B*S, D)
    h2 = h2 + pe2

    # ---- 2) transformer encoder layers (post-norm, ReLU FFN, eval-mode dropout) ----
    for l in range(num_layers):
        qkv = jnp.dot(h2, wqkv_ref[l], preferred_element_type=jnp.float32) + bqkv_ref[l]
        q3 = qkv[:, 0 * D:1 * D].reshape(B, S, D)
        k3 = qkv[:, 1 * D:2 * D].reshape(B, S, D)
        v3 = qkv[:, 2 * D:3 * D].reshape(B, S, D)

        heads = []
        for hh in range(nhead):
            qh = q3[..., hh * hd:(hh + 1) * hd]
            kh = k3[..., hh * hd:(hh + 1) * hd]
            vh = v3[..., hh * hd:(hh + 1) * hd]
            s = jnp.einsum('bqd,bkd->bqk', qh, kh,
                           preferred_element_type=jnp.float32) * scale + bias
            s = s - jnp.max(s, axis=-1, keepdims=True)
            p = jnp.exp(s)
            p = p * pl.reciprocal(jnp.sum(p, axis=-1, keepdims=True), approx=True)
            heads.append(jnp.einsum('bqk,bkd->bqd', p, vh,
                                    preferred_element_type=jnp.float32))
        attn2 = jnp.concatenate(heads, axis=-1).reshape(BS, D)
        sa = jnp.dot(attn2, wo_ref[l], preferred_element_type=jnp.float32) + bo_ref[l]
        h2 = layer_norm(h2 + sa, ln1w_ref[l], ln1b_ref[l])

        ff = jnp.dot(h2, w1_ref[l], preferred_element_type=jnp.float32) + b1_ref[l]
        ff = jnp.maximum(ff, 0.0)
        ff = jnp.dot(ff, w2_ref[l], preferred_element_type=jnp.float32) + b2_ref[l]
        h2 = layer_norm(h2 + ff, ln2w_ref[l], ln2b_ref[l])

    # ---- 3) last-valid-token gather (one-hot matmul) + output head ----
    last = jnp.dot(onehot_last, h2, preferred_element_type=jnp.float32)  # (B, D)
    o_ref[...] = (jnp.dot(last, w_out_ref[...],
                          preferred_element_type=jnp.float32) + b_out_ref[...])


def sequence_transformer_forward(params, pe, x, mask, nhead):
    B, S, F = x.shape
    D = params["w_in"].shape[1]
    OUT = params["w_out"].shape[1]
    L = params["wqkv"].shape[0]
    F4 = params["w1"].shape[2]

    seq_lengths = jnp.sum(mask.astype(jnp.int32), axis=1)      # (B,) valid-token counts

    kern = functools.partial(_fused_forward_kernel, nhead=nhead, num_layers=L)
    c2 = lambda i, lens: (0, 0)
    c3 = lambda i, lens: (0, 0, 0)

    grid_spec = pltpu.PrefetchScalarGridSpec(
        num_scalar_prefetch=1,
        grid=(1,),
        in_specs=[
            pl.BlockSpec((B, S, F), c3),        # x
            pl.BlockSpec((F, D), c2),           # w_in
            pl.BlockSpec((1, D), c2),           # b_in
            pl.BlockSpec((S, D), c2),           # pe
            pl.BlockSpec((L, D, 3 * D), c3),    # wqkv (stacked over layers)
            pl.BlockSpec((L, 1, 3 * D), c3),    # bqkv
            pl.BlockSpec((L, D, D), c3),        # wo
            pl.BlockSpec((L, 1, D), c3),        # bo
            pl.BlockSpec((L, 1, D), c3),        # ln1w
            pl.BlockSpec((L, 1, D), c3),        # ln1b
            pl.BlockSpec((L, D, F4), c3),       # w1
            pl.BlockSpec((L, 1, F4), c3),       # b1
            pl.BlockSpec((L, F4, D), c3),       # w2
            pl.BlockSpec((L, 1, D), c3),        # b2
            pl.BlockSpec((L, 1, D), c3),        # ln2w
            pl.BlockSpec((L, 1, D), c3),        # ln2b
            pl.BlockSpec((D, OUT), c2),         # w_out
            pl.BlockSpec((1, OUT), c2),         # b_out
        ],
        out_specs=pl.BlockSpec((B, OUT), c2),
    )

    return pl.pallas_call(
        kern,
        out_shape=jax.ShapeDtypeStruct((B, OUT), jnp.float32),
        grid_spec=grid_spec,
        compiler_params=pltpu.CompilerParams(
            dimension_semantics=("arbitrary",),
            vmem_limit_bytes=32 * 1024 * 1024,
        ),
    )(seq_lengths, x, params["w_in"], params["b_in"], pe,
      params["wqkv"], params["bqkv"], params["wo"], params["bo"],
      params["ln1w"], params["ln1b"], params["w1"], params["b1"],
      params["w2"], params["b2"], params["ln2w"], params["ln2b"],
      params["w_out"], params["b_out"])


# ----------------------------- model setup -------------------------------

def make_positional_encoding(seq_len, d_model):
    position = np.arange(seq_len, dtype=np.float32)[:, None]
    div_term = np.exp(np.arange(0, d_model, 2, dtype=np.float32)
                      * (-math.log(10000.0) / d_model))
    pe = np.zeros((seq_len, d_model), dtype=np.float32)
    pe[:, 0::2] = np.sin(position * div_term)
    pe[:, 1::2] = np.cos(position * div_term)
    return jnp.asarray(pe)


def init_params(key, feature_dim, model_dim, nhead, num_layers, out_dim):
    ks = iter(jax.random.split(key, 32))
    nrm = lambda shape, s: jax.random.normal(next(ks), shape, jnp.float32) * s
    D, F4, L = model_dim, 4 * model_dim, num_layers
    # TODO(synk): weights kept f32 everywhere; at larger D use bf16 weights with
    # f32 accumulation on v6e/v7x (irrelevant at this overhead-bound size).
    return {
        "w_in": nrm((feature_dim, D), 0.1), "b_in": nrm((1, D), 0.01),
        "w_out": nrm((D, out_dim), 0.1),    "b_out": nrm((1, out_dim), 0.01),
        "wqkv": nrm((L, D, 3 * D), 0.1),    "bqkv": nrm((L, 1, 3 * D), 0.01),
        "wo": nrm((L, D, D), 0.1),          "bo": nrm((L, 1, D), 0.01),
        "ln1w": jnp.ones((L, 1, D), jnp.float32), "ln1b": jnp.zeros((L, 1, D), jnp.float32),
        "w1": nrm((L, D, F4), 0.1),         "b1": nrm((L, 1, F4), 0.01),
        "w2": nrm((L, F4, D), 0.1),         "b2": nrm((L, 1, D), 0.01),
        "ln2w": jnp.ones((L, 1, D), jnp.float32), "ln2b": jnp.zeros((L, 1, D), jnp.float32),
    }


# ----------------------------- pure-JAX reference ---------------------------

def ref_forward(params, pe, x, mask, nhead):
    B, S, _ = x.shape
    D = params["w_in"].shape[1]
    hd = D // nhead
    L = params["wqkv"].shape[0]

    def ln(y, w, b):
        mu = y.mean(-1, keepdims=True)
        var = ((y - mu) ** 2).mean(-1, keepdims=True)
        return (y - mu) / jnp.sqrt(var + 1e-5) * w + b

    h = x @ params["w_in"] + params["b_in"] + pe[None]
    bias3 = jnp.where(mask, 0.0, -1e9).astype(jnp.float32)[:, None, :]
    for l in range(L):
        qkv = h @ params["wqkv"][l] + params["bqkv"][l]
        q, k, v = jnp.split(qkv, 3, axis=-1)
        q = q.reshape(B, S, nhead, hd).transpose(0, 2, 1, 3)
        k = k.reshape(B, S, nhead, hd).transpose(0, 2, 1, 3)
        v = v.reshape(B, S, nhead, hd).transpose(0, 2, 1, 3)
        s = jnp.einsum("bhqd,bhkd->bhqk", q, k) / math.sqrt(hd) + bias3[:, None, :, :]
        a = jax.nn.softmax(s, axis=-1)
        o = jnp.einsum("bhqk,bhkd->bhqd", a, v).transpose(0, 2, 1, 3).reshape(B, S, D)
        sa = o @ params["wo"][l] + params["bo"][l]
        h = ln(h + sa, params["ln1w"][l], params["ln1b"][l])
        ff = jnp.maximum(h @ params["w1"][l] + params["b1"][l], 0.0) @ params["w2"][l] + params["b2"][l]
        h = ln(h + ff, params["ln2w"][l], params["ln2b"][l])
    seq_lengths = jnp.sum(mask.astype(jnp.int32), axis=1) - 1
    last_tok = h[jnp.arange(B), seq_lengths]
    return last_tok @ params["w_out"] + params["b_out"]


# ----------------------------------- main -----------------------------------

if __name__ == "__main__":
    # SequenceTransformer(feature_dim=16, model_dim=32, nhead=4, num_layers=2,
    #                     prediction_type='goals')  -> output (B, 2)
    B, S, F, D, H, L, OUT = 2, 8, 16, 32, 4, 2, 2

    key = jax.random.PRNGKey(0)
    k_x, k_p = jax.random.split(key)
    x = jax.random.normal(k_x, (B, S, F), jnp.float32)
    lengths = jnp.array([8, 5], jnp.int32)
    mask = jnp.arange(S)[None, :] < lengths[:, None]        # (B, S) bool, True = valid

    params = init_params(k_p, F, D, H, L, OUT)
    pe = make_positional_encoding(S, D)

    # TODO(synk): dropout (p=0.1) is a no-op here (eval-mode semantics).
    out = sequence_transformer_forward(params, pe, x, mask, H)
    out = jax.block_until_ready(out)

    ref = jax.block_until_ready(ref_forward(params, pe, x, mask, H))
    np.testing.assert_allclose(np.asarray(out), np.asarray(ref), rtol=2e-2, atol=2e-2)

    assert out.shape == (B, OUT)
    print("KERNEL_OK")
</pallas_src>

<mosaic_0001>
module attributes {stable_mosaic.version = 11 : i64} {
  func.func @_fused_forward_kernel(%arg0: i32, %arg1: memref<2xi32, #tpu.memory_space<smem>>, %arg2: memref<2x8x16xf32, #tpu.memory_space<vmem>>, %arg3: memref<16x32xf32, #tpu.memory_space<vmem>>, %arg4: memref<1x32xf32, #tpu.memory_space<vmem>>, %arg5: memref<8x32xf32, #tpu.memory_space<vmem>>, %arg6: memref<2x32x96xf32, #tpu.memory_space<vmem>>, %arg7: memref<2x1x96xf32, #tpu.memory_space<vmem>>, %arg8: memref<2x32x32xf32, #tpu.memory_space<vmem>>, %arg9: memref<2x1x32xf32, #tpu.memory_space<vmem>>, %arg10: memref<2x1x32xf32, #tpu.memory_space<vmem>>, %arg11: memref<2x1x32xf32, #tpu.memory_space<vmem>>, %arg12: memref<2x32x128xf32, #tpu.memory_space<vmem>>, %arg13: memref<2x1x128xf32, #tpu.memory_space<vmem>>, %arg14: memref<2x128x32xf32, #tpu.memory_space<vmem>>, %arg15: memref<2x1x32xf32, #tpu.memory_space<vmem>>, %arg16: memref<2x1x32xf32, #tpu.memory_space<vmem>>, %arg17: memref<2x1x32xf32, #tpu.memory_space<vmem>>, %arg18: memref<32x2xf32, #tpu.memory_space<vmem>>, %arg19: memref<1x2xf32, #tpu.memory_space<vmem>>, %arg20: memref<2x2xf32, #tpu.memory_space<vmem>>) attributes {dimension_semantics = [#tpu.dimension_semantics<arbitrary>], iteration_bounds = array<i64: 1>, scalar_prefetch = 1 : i64, scratch_operands = 0 : i64, tpu.core_type = #tpu.core_type<tc>, window_params = [{pipeline_mode = #tpu.pipeline_mode<synchronous>, transform_indices = @transform_0, window_bounds = array<i64: 2, 8, 16>}, {pipeline_mode = #tpu.pipeline_mode<synchronous>, transform_indices = @transform_1, window_bounds = array<i64: 16, 32>}, {pipeline_mode = #tpu.pipeline_mode<synchronous>, transform_indices = @transform_2, window_bounds = array<i64: 1, 32>}, {pipeline_mode = #tpu.pipeline_mode<synchronous>, transform_indices = @transform_3, window_bounds = array<i64: 8, 32>}, {pipeline_mode = #tpu.pipeline_mode<synchronous>, transform_indices = @transform_4, window_bounds = array<i64: 2, 32, 96>}, {pipeline_mode = #tpu.pipeline_mode<synchronous>, transform_indices = @transform_5, window_bounds = array<i64: 2, 1, 96>}, {pipeline_mode = #tpu.pipeline_mode<synchronous>, transform_indices = @transform_6, window_bounds = array<i64: 2, 32, 32>}, {pipeline_mode = #tpu.pipeline_mode<synchronous>, transform_indices = @transform_7, window_bounds = array<i64: 2, 1, 32>}, {pipeline_mode = #tpu.pipeline_mode<synchronous>, transform_indices = @transform_8, window_bounds = array<i64: 2, 1, 32>}, {pipeline_mode = #tpu.pipeline_mode<synchronous>, transform_indices = @transform_9, window_bounds = array<i64: 2, 1, 32>}, {pipeline_mode = #tpu.pipeline_mode<synchronous>, transform_indices = @transform_10, window_bounds = array<i64: 2, 32, 128>}, {pipeline_mode = #tpu.pipeline_mode<synchronous>, transform_indices = @transform_11, window_bounds = array<i64: 2, 1, 128>}, {pipeline_mode = #tpu.pipeline_mode<synchronous>, transform_indices = @transform_12, window_bounds = array<i64: 2, 128, 32>}, {pipeline_mode = #tpu.pipeline_mode<synchronous>, transform_indices = @transform_13, window_bounds = array<i64: 2, 1, 32>}, {pipeline_mode = #tpu.pipeline_mode<synchronous>, transform_indices = @transform_14, window_bounds = array<i64: 2, 1, 32>}, {pipeline_mode = #tpu.pipeline_mode<synchronous>, transform_indices = @transform_15, window_bounds = array<i64: 2, 1, 32>}, {pipeline_mode = #tpu.pipeline_mode<synchronous>, transform_indices = @transform_16, window_bounds = array<i64: 32, 2>}, {pipeline_mode = #tpu.pipeline_mode<synchronous>, transform_indices = @transform_17, window_bounds = array<i64: 1, 2>}, {pipeline_mode = #tpu.pipeline_mode<synchronous>, transform_indices = @transform_18, window_bounds = array<i64: 2, 2>}]} {
    %0 = tpu.iota {dimensions = array<i32: 2>} : vector<2x1x8xi32>
    %1 = tpu.iota {dimensions = array<i32: 0>} : vector<2x1x8xi32>
    %c0_i32 = arith.constant 0 : i32
    %2 = vector.broadcast %c0_i32 : i32 to vector<2x1x8xi32>
    %c0_i32_0 = arith.constant 0 : i32
    %3 = vector.broadcast %c0_i32_0 : i32 to vector<2x1x8xi32>
    %4 = arith.cmpi eq, %1, %3 : vector<2x1x8xi32>
    %c0 = arith.constant 0 : index
    %5 = memref.load %arg1[%c0] : memref<2xi32, #tpu.memory_space<smem>>
    %6 = vector.broadcast %5 : i32 to vector<2x1x8xi32>
    %7 = arith.select %4, %6, %2 : vector<2x1x8xi1>, vector<2x1x8xi32>
    %c1_i32 = arith.constant 1 : i32
    %8 = vector.broadcast %c1_i32 : i32 to vector<2x1x8xi32>
    %9 = arith.cmpi eq, %1, %8 : vector<2x1x8xi32>
    %c1 = arith.constant 1 : index
    %10 = memref.load %arg1[%c1] : memref<2xi32, #tpu.memory_space<smem>>
    %11 = vector.broadcast %10 : i32 to vector<2x1x8xi32>
    %12 = arith.select %9, %11, %7 : vector<2x1x8xi1>, vector<2x1x8xi32>
    %13 = arith.cmpi slt, %0, %12 : vector<2x1x8xi32>
    %cst = arith.constant 0.000000e+00 : f32
    %cst_1 = arith.constant -1.000000e+09 : f32
    %14 = vector.broadcast %cst : f32 to vector<2x1x8xf32>
    %15 = vector.broadcast %cst_1 : f32 to vector<2x1x8xf32>
    %16 = arith.select %13, %14, %15 : vector<2x1x8xi1>, vector<2x1x8xf32>
    %17 = tpu.iota {dimensions = array<i32: 1>} : vector<2x16xi32>
    %18 = tpu.iota {dimensions = array<i32: 0>} : vector<2x16xi32>
    %c0_i32_2 = arith.constant 0 : i32
    %19 = vector.broadcast %c0_i32_2 : i32 to vector<2x16xi32>
    %c0_i32_3 = arith.constant 0 : i32
    %20 = vector.broadcast %c0_i32_3 : i32 to vector<2x16xi32>
    %21 = arith.cmpi eq, %18, %20 : vector<2x16xi32>
    %c0_4 = arith.constant 0 : index
    %22 = memref.load %arg1[%c0_4] : memref<2xi32, #tpu.memory_space<smem>>
    %c0_i32_5 = arith.constant 0 : i32
    %23 = arith.addi %c0_i32_5, %22 : i32
    %c1_i32_6 = arith.constant 1 : i32
    %24 = arith.subi %23, %c1_i32_6 : i32
    %25 = vector.broadcast %24 : i32 to vector<2x16xi32>
    %26 = arith.select %21, %25, %19 : vector<2x16xi1>, vector<2x16xi32>
    %c1_i32_7 = arith.constant 1 : i32
    %27 = vector.broadcast %c1_i32_7 : i32 to vector<2x16xi32>
    %28 = arith.cmpi eq, %18, %27 : vector<2x16xi32>
    %c1_8 = arith.constant 1 : index
    %29 = memref.load %arg1[%c1_8] : memref<2xi32, #tpu.memory_space<smem>>
    %c8_i32 = arith.constant 8 : i32
    %30 = arith.addi %c8_i32, %29 : i32
    %c1_i32_9 = arith.constant 1 : i32
    %31 = arith.subi %30, %c1_i32_9 : i32
    %32 = vector.broadcast %31 : i32 to vector<2x16xi32>
    %33 = arith.select %28, %32, %26 : vector<2x16xi1>, vector<2x16xi32>
    %34 = arith.cmpi eq, %17, %33 : vector<2x16xi32>
    %cst_10 = arith.constant 1.000000e+00 : f32
    %cst_11 = arith.constant 0.000000e+00 : f32
    %35 = vector.broadcast %cst_10 : f32 to vector<2x16xf32>
    %36 = vector.broadcast %cst_11 : f32 to vector<2x16xf32>
    %37 = arith.select %34, %35, %36 : vector<2x16xi1>, vector<2x16xf32>
    %c0_12 = arith.constant 0 : index
    %c0_13 = arith.constant 0 : index
    %c0_14 = arith.constant 0 : index
    %38 = vector.load %arg2[%c0_12, %c0_13, %c0_14] : memref<2x8x16xf32, #tpu.memory_space<vmem>>, vector<2x8x16xf32>
    %39 = vector.shape_cast %38 : vector<2x8x16xf32> to vector<16x16xf32>
    %c0_15 = arith.constant 0 : index
    %c0_16 = arith.constant 0 : index
    %40 = vector.load %arg3[%c0_15, %c0_16] : memref<16x32xf32, #tpu.memory_space<vmem>>, vector<16x32xf32>
    %cst_17 = arith.constant dense<0.000000e+00> : vector<16x32xf32>
    %41 = tpu.matmul %39, %40, %cst_17 {dimension_numbers = #tpu.dot_dimension_numbers<[1], [0], [0], [1], [0, 0, 1, 1], [], []>} : vector<16x16xf32>, vector<16x32xf32>, vector<16x32xf32> -> vector<16x32xf32>
    %c0_18 = arith.constant 0 : index
    %c0_19 = arith.constant 0 : index
    %42 = vector.load %arg4[%c0_18, %c0_19] : memref<1x32xf32, #tpu.memory_space<vmem>>, vector<1x32xf32>
    %43 = vector.broadcast %42 : vector<1x32xf32> to vector<16x32xf32>
    %44 = arith.addf %41, %43 : vector<16x32xf32>
    %c0_20 = arith.constant 0 : index
    %c0_21 = arith.constant 0 : index
    %45 = vector.load %arg5[%c0_20, %c0_21] : memref<8x32xf32, #tpu.memory_space<vmem>>, vector<8x32xf32>
    %46 = tpu.concatenate %45, %45 in 0 : vector<8x32xf32>, vector<8x32xf32> -> vector<16x32xf32>
    %47 = arith.addf %44, %46 : vector<16x32xf32>
    %c0_22 = arith.constant 0 : index
    %c0_23 = arith.constant 0 : index
    %c0_24 = arith.constant 0 : index
    %48 = vector.load %arg6[%c0_22, %c0_23, %c0_24] : memref<2x32x96xf32, #tpu.memory_space<vmem>>, vector<1x32x96xf32>
    %49 = vector.shape_cast %48 : vector<1x32x96xf32> to vector<32x96xf32>
    %cst_25 = arith.constant dense<0.000000e+00> : vector<16x96xf32>
    %50 = tpu.matmul %47, %49, %cst_25 {dimension_numbers = #tpu.dot_dimension_numbers<[1], [0], [0], [1], [0, 0, 1, 1], [], []>} : vector<16x32xf32>, vector<32x96xf32>, vector<16x96xf32> -> vector<16x96xf32>
    %c0_26 = arith.constant 0 : index
    %c0_27 = arith.constant 0 : index
    %c0_28 = arith.constant 0 : index
    %51 = vector.load %arg7[%c0_26, %c0_27, %c0_28] : memref<2x1x96xf32, #tpu.memory_space<vmem>>, vector<1x1x96xf32>
    %52 = vector.shape_cast %51 : vector<1x1x96xf32> to vector<1x96xf32>
    %53 = vector.broadcast %52 : vector<1x96xf32> to vector<16x96xf32>
    %54 = arith.addf %50, %53 : vector<16x96xf32>
    %55 = vector.extract_strided_slice %54 {offsets = [0, 0], sizes = [16, 32], strides = [1, 1]} : vector<16x96xf32> to vector<16x32xf32>
    %56 = vector.shape_cast %55 : vector<16x32xf32> to vector<2x8x32xf32>
    %57 = vector.extract_strided_slice %54 {offsets = [0, 32], sizes = [16, 32], strides = [1, 1]} : vector<16x96xf32> to vector<16x32xf32>
    %58 = vector.shape_cast %57 : vector<16x32xf32> to vector<2x8x32xf32>
    %59 = vector.extract_strided_slice %54 {offsets = [0, 64], sizes = [16, 32], strides = [1, 1]} : vector<16x96xf32> to vector<16x32xf32>
    %60 = vector.shape_cast %59 : vector<16x32xf32> to vector<2x8x32xf32>
    %61 = vector.extract_strided_slice %56 {offsets = [0, 0, 0], sizes = [2, 8, 8], strides = [1, 1, 1]} : vector<2x8x32xf32> to vector<2x8x8xf32>
    %62 = vector.extract_strided_slice %58 {offsets = [0, 0, 0], sizes = [2, 8, 8], strides = [1, 1, 1]} : vector<2x8x32xf32> to vector<2x8x8xf32>
    %63 = vector.extract_strided_slice %60 {offsets = [0, 0, 0], sizes = [2, 8, 8], strides = [1, 1, 1]} : vector<2x8x32xf32> to vector<2x8x8xf32>
    "tpu.trace_start"() <{level = 10 : i32, message = "bqd,bkd->bqk"}> : () -> ()
    %cst_29 = arith.constant dense<0.000000e+00> : vector<2x8x8xf32>
    %64 = tpu.matmul %61, %62, %cst_29 {dimension_numbers = #tpu.dot_dimension_numbers<[2], [2], [1], [1], [0, 0, 0, 1, 1, 1], [0], [0]>} : vector<2x8x8xf32>, vector<2x8x8xf32>, vector<2x8x8xf32> -> vector<2x8x8xf32>
    "tpu.trace_stop"() : () -> ()
    %cst_30 = arith.constant 0.353553385 : f32
    %65 = vector.broadcast %cst_30 : f32 to vector<2x8x8xf32>
    %66 = arith.mulf %64, %65 : vector<2x8x8xf32>
    %67 = vector.broadcast %16 : vector<2x1x8xf32> to vector<2x8x8xf32>
    %68 = arith.addf %66, %67 : vector<2x8x8xf32>
    %cst_31 = arith.constant dense<0xFF800000> : vector<2x8xf32>
    %69 = vector.multi_reduction <maximumf>, %68, %cst_31 [2] : vector<2x8x8xf32> to vector<2x8xf32>
    %70 = vector.shape_cast %69 : vector<2x8xf32> to vector<2x8x1xf32>
    %71 = vector.broadcast %70 : vector<2x8x1xf32> to vector<2x8x8xf32>
    %72 = arith.subf %68, %71 : vector<2x8x8xf32>
    %73 = math.exp %72 : vector<2x8x8xf32>
    %cst_32 = arith.constant dense<0.000000e+00> : vector<2x8xf32>
    %74 = vector.multi_reduction <add>, %73, %cst_32 [2] : vector<2x8x8xf32> to vector<2x8xf32>
    %75 = vector.shape_cast %74 : vector<2x8xf32> to vector<2x8x1xf32>
    %76 = tpu.reciprocal %75 {approx = true} : vector<2x8x1xf32> -> vector<2x8x1xf32>
    %77 = vector.broadcast %76 : vector<2x8x1xf32> to vector<2x8x8xf32>
    %78 = arith.mulf %73, %77 : vector<2x8x8xf32>
    "tpu.trace_start"() <{level = 10 : i32, message = "bqk,bkd->bqd"}> : () -> ()
    %cst_33 = arith.constant dense<0.000000e+00> : vector<2x8x8xf32>
    %79 = tpu.matmul %78, %63, %cst_33 {dimension_numbers = #tpu.dot_dimension_numbers<[2], [1], [1], [2], [0, 0, 0, 1, 1, 2], [0], [0]>} : vector<2x8x8xf32>, vector<2x8x8xf32>, vector<2x8x8xf32> -> vector<2x8x8xf32>
    "tpu.trace_stop"() : () -> ()
    %80 = vector.extract_strided_slice %56 {offsets = [0, 0, 8], sizes = [2, 8, 8], strides = [1, 1, 1]} : vector<2x8x32xf32> to vector<2x8x8xf32>
    %81 = vector.extract_strided_slice %58 {offsets = [0, 0, 8], sizes = [2, 8, 8], strides = [1, 1, 1]} : vector<2x8x32xf32> to vector<2x8x8xf32>
    %82 = vector.extract_strided_slice %60 {offsets = [0, 0, 8], sizes = [2, 8, 8], strides = [1, 1, 1]} : vector<2x8x32xf32> to vector<2x8x8xf32>
    "tpu.trace_start"() <{level = 10 : i32, message = "bqd,bkd->bqk"}> : () -> ()
    %cst_34 = arith.constant dense<0.000000e+00> : vector<2x8x8xf32>
    %83 = tpu.matmul %80, %81, %cst_34 {dimension_numbers = #tpu.dot_dimension_numbers<[2], [2], [1], [1], [0, 0, 0, 1, 1, 1], [0], [0]>} : vector<2x8x8xf32>, vector<2x8x8xf32>, vector<2x8x8xf32> -> vector<2x8x8xf32>
    "tpu.trace_stop"() : () -> ()
    %cst_35 = arith.constant 0.353553385 : f32
    %84 = vector.broadcast %cst_35 : f32 to vector<2x8x8xf32>
    %85 = arith.mulf %83, %84 : vector<2x8x8xf32>
    %86 = vector.broadcast %16 : vector<2x1x8xf32> to vector<2x8x8xf32>
    %87 = arith.addf %85, %86 : vector<2x8x8xf32>
    %cst_36 = arith.constant dense<0xFF800000> : vector<2x8xf32>
    %88 = vector.multi_reduction <maximumf>, %87, %cst_36 [2] : vector<2x8x8xf32> to vector<2x8xf32>
    %89 = vector.shape_cast %88 : vector<2x8xf32> to vector<2x8x1xf32>
    %90 = vector.broadcast %89 : vector<2x8x1xf32> to vector<2x8x8xf32>
    %91 = arith.subf %87, %90 : vector<2x8x8xf32>
    %92 = math.exp %91 : vector<2x8x8xf32>
    %cst_37 = arith.constant dense<0.000000e+00> : vector<2x8xf32>
    %93 = vector.multi_reduction <add>, %92, %cst_37 [2] : vector<2x8x8xf32> to vector<2x8xf32>
    %94 = vector.shape_cast %93 : vector<2x8xf32> to vector<2x8x1xf32>
    %95 = tpu.reciprocal %94 {approx = true} : vector<2x8x1xf32> -> vector<2x8x1xf32>
    %96 = vector.broadcast %95 : vector<2x8x1xf32> to vector<2x8x8xf32>
    %97 = arith.mulf %92, %96 : vector<2x8x8xf32>
    "tpu.trace_start"() <{level = 10 : i32, message = "bqk,bkd->bqd"}> : () -> ()
    %cst_38 = arith.constant dense<0.000000e+00> : vector<2x8x8xf32>
    %98 = tpu.matmul %97, %82, %cst_38 {dimension_numbers = #tpu.dot_dimension_numbers<[2], [1], [1], [2], [0, 0, 0, 1, 1, 2], [0], [0]>} : vector<2x8x8xf32>, vector<2x8x8xf32>, vector<2x8x8xf32> -> vector<2x8x8xf32>
    "tpu.trace_stop"() : () -> ()
    %99 = vector.extract_strided_slice %56 {offsets = [0, 0, 16], sizes = [2, 8, 8], strides = [1, 1, 1]} : vector<2x8x32xf32> to vector<2x8x8xf32>
    %100 = vector.extract_strided_slice %58 {offsets = [0, 0, 16], sizes = [2, 8, 8], strides = [1, 1, 1]} : vector<2x8x32xf32> to vector<2x8x8xf32>
    %101 = vector.extract_strided_slice %60 {offsets = [0, 0, 16], sizes = [2, 8, 8], strides = [1, 1, 1]} : vector<2x8x32xf32> to vector<2x8x8xf32>
    "tpu.trace_start"() <{level = 10 : i32, message = "bqd,bkd->bqk"}> : () -> ()
    %cst_39 = arith.constant dense<0.000000e+00> : vector<2x8x8xf32>
    %102 = tpu.matmul %99, %100, %cst_39 {dimension_numbers = #tpu.dot_dimension_numbers<[2], [2], [1], [1], [0, 0, 0, 1, 1, 1], [0], [0]>} : vector<2x8x8xf32>, vector<2x8x8xf32>, vector<2x8x8xf32> -> vector<2x8x8xf32>
    "tpu.trace_stop"() : () -> ()
    %cst_40 = arith.constant 0.353553385 : f32
    %103 = vector.broadcast %cst_40 : f32 to vector<2x8x8xf32>
    %104 = arith.mulf %102, %103 : vector<2x8x8xf32>
    %105 = vector.broadcast %16 : vector<2x1x8xf32> to vector<2x8x8xf32>
    %106 = arith.addf %104, %105 : vector<2x8x8xf32>
    %cst_41 = arith.constant dense<0xFF800000> : vector<2x8xf32>
    %107 = vector.multi_reduction <maximumf>, %106, %cst_41 [2] : vector<2x8x8xf32> to vector<2x8xf32>
    %108 = vector.shape_cast %107 : vector<2x8xf32> to vector<2x8x1xf32>
    %109 = vector.broadcast %108 : vector<2x8x1xf32> to vector<2x8x8xf32>
    %110 = arith.subf %106, %109 : vector<2x8x8xf32>
    %111 = math.exp %110 : vector<2x8x8xf32>
    %cst_42 = arith.constant dense<0.000000e+00> : vector<2x8xf32>
    %112 = vector.multi_reduction <add>, %111, %cst_42 [2] : vector<2x8x8xf32> to vector<2x8xf32>
    %113 = vector.shape_cast %112 : vector<2x8xf32> to vector<2x8x1xf32>
    %114 = tpu.reciprocal %113 {approx = true} : vector<2x8x1xf32> -> vector<2x8x1xf32>
    %115 = vector.broadcast %114 : vector<2x8x1xf32> to vector<2x8x8xf32>
    %116 = arith.mulf %111, %115 : vector<2x8x8xf32>
    "tpu.trace_start"() <{level = 10 : i32, message = "bqk,bkd->bqd"}> : () -> ()
    %cst_43 = arith.constant dense<0.000000e+00> : vector<2x8x8xf32>
    %117 = tpu.matmul %116, %101, %cst_43 {dimension_numbers = #tpu.dot_dimension_numbers<[2], [1], [1], [2], [0, 0, 0, 1, 1, 2], [0], [0]>} : vector<2x8x8xf32>, vector<2x8x8xf32>, vector<2x8x8xf32> -> vector<2x8x8xf32>
    "tpu.trace_stop"() : () -> ()
    %118 = vector.extract_strided_slice %56 {offsets = [0, 0, 24], sizes = [2, 8, 8], strides = [1, 1, 1]} : vector<2x8x32xf32> to vector<2x8x8xf32>
    %119 = vector.extract_strided_slice %58 {offsets = [0, 0, 24], sizes = [2, 8, 8], strides = [1, 1, 1]} : vector<2x8x32xf32> to vector<2x8x8xf32>
    %120 = vector.extract_strided_slice %60 {offsets = [0, 0, 24], sizes = [2, 8, 8], strides = [1, 1, 1]} : vector<2x8x32xf32> to vector<2x8x8xf32>
    "tpu.trace_start"() <{level = 10 : i32, message = "bqd,bkd->bqk"}> : () -> ()
    %cst_44 = arith.constant dense<0.000000e+00> : vector<2x8x8xf32>
    %121 = tpu.matmul %118, %119, %cst_44 {dimension_numbers = #tpu.dot_dimension_numbers<[2], [2], [1], [1], [0, 0, 0, 1, 1, 1], [0], [0]>} : vector<2x8x8xf32>, vector<2x8x8xf32>, vector<2x8x8xf32> -> vector<2x8x8xf32>
    "tpu.trace_stop"() : () -> ()
    %cst_45 = arith.constant 0.353553385 : f32
    %122 = vector.broadcast %cst_45 : f32 to vector<2x8x8xf32>
    %123 = arith.mulf %121, %122 : vector<2x8x8xf32>
    %124 = vector.broadcast %16 : vector<2x1x8xf32> to vector<2x8x8xf32>
    %125 = arith.addf %123, %124 : vector<2x8x8xf32>
    %cst_46 = arith.constant dense<0xFF800000> : vector<2x8xf32>
    %126 = vector.multi_reduction <maximumf>, %125, %cst_46 [2] : vector<2x8x8xf32> to vector<2x8xf32>
    %127 = vector.shape_cast %126 : vector<2x8xf32> to vector<2x8x1xf32>
    %128 = vector.broadcast %127 : vector<2x8x1xf32> to vector<2x8x8xf32>
    %129 = arith.subf %125, %128 : vector<2x8x8xf32>
    %130 = math.exp %129 : vector<2x8x8xf32>
    %cst_47 = arith.constant dense<0.000000e+00> : vector<2x8xf32>
    %131 = vector.multi_reduction <add>, %130, %cst_47 [2] : vector<2x8x8xf32> to vector<2x8xf32>
    %132 = vector.shape_cast %131 : vector<2x8xf32> to vector<2x8x1xf32>
    %133 = tpu.reciprocal %132 {approx = true} : vector<2x8x1xf32> -> vector<2x8x1xf32>
    %134 = vector.broadcast %133 : vector<2x8x1xf32> to vector<2x8x8xf32>
    %135 = arith.mulf %130, %134 : vector<2x8x8xf32>
    "tpu.trace_start"() <{level = 10 : i32, message = "bqk,bkd->bqd"}> : () -> ()
    %cst_48 = arith.constant dense<0.000000e+00> : vector<2x8x8xf32>
    %136 = tpu.matmul %135, %120, %cst_48 {dimension_numbers = #tpu.dot_dimension_numbers<[2], [1], [1], [2], [0, 0, 0, 1, 1, 2], [0], [0]>} : vector<2x8x8xf32>, vector<2x8x8xf32>, vector<2x8x8xf32> -> vector<2x8x8xf32>
    "tpu.trace_stop"() : () -> ()
    %137 = tpu.concatenate %79, %98, %117, %136 in 2 : vector<2x8x8xf32>, vector<2x8x8xf32>, vector<2x8x8xf32>, vector<2x8x8xf32> -> vector<2x8x32xf32>
    %138 = vector.shape_cast %137 : vector<2x8x32xf32> to vector<16x32xf32>
    %c0_49 = arith.constant 0 : index
    %c0_50 = arith.constant 0 : index
    %c0_51 = arith.constant 0 : index
    %139 = vector.load %arg8[%c0_49, %c0_50, %c0_51] : memref<2x32x32xf32, #tpu.memory_space<vmem>>, vector<1x32x32xf32>
    %140 = vector.shape_cast %139 : vector<1x32x32xf32> to vector<32x32xf32>
    %cst_52 = arith.constant dense<0.000000e+00> : vector<16x32xf32>
    %141 = tpu.matmul %138, %140, %cst_52 {dimension_numbers = #tpu.dot_dimension_numbers<[1], [0], [0], [1], [0, 0, 1, 1], [], []>} : vector<16x32xf32>, vector<32x32xf32>, vector<16x32xf32> -> vector<16x32xf32>
    %c0_53 = arith.constant 0 : index
    %c0_54 = arith.constant 0 : index
    %c0_55 = arith.constant 0 : index
    %142 = vector.load %arg9[%c0_53, %c0_54, %c0_55] : memref<2x1x32xf32, #tpu.memory_space<vmem>>, vector<1x1x32xf32>
    %143 = vector.shape_cast %142 : vector<1x1x32xf32> to vector<1x32xf32>
    %144 = vector.broadcast %143 : vector<1x32xf32> to vector<16x32xf32>
    %145 = arith.addf %141, %144 : vector<16x32xf32>
    %146 = arith.addf %47, %145 : vector<16x32xf32>
    %c0_56 = arith.constant 0 : index
    %c0_57 = arith.constant 0 : index
    %c0_58 = arith.constant 0 : index
    %147 = vector.load %arg10[%c0_56, %c0_57, %c0_58] : memref<2x1x32xf32, #tpu.memory_space<vmem>>, vector<1x1x32xf32>
    %148 = vector.shape_cast %147 : vector<1x1x32xf32> to vector<1x32xf32>
    %c0_59 = arith.constant 0 : index
    %c0_60 = arith.constant 0 : index
    %c0_61 = arith.constant 0 : index
    %149 = vector.load %arg11[%c0_59, %c0_60, %c0_61] : memref<2x1x32xf32, #tpu.memory_space<vmem>>, vector<1x1x32xf32>
    %150 = vector.shape_cast %149 : vector<1x1x32xf32> to vector<1x32xf32>
    %cst_62 = arith.constant dense<0.000000e+00> : vector<16xf32>
    %151 = vector.multi_reduction <add>, %146, %cst_62 [1] : vector<16x32xf32> to vector<16xf32>
    %152 = vector.shape_cast %151 : vector<16xf32> to vector<16x1xf32>
    %cst_63 = arith.constant 3.200000e+01 : f32
    %153 = vector.broadcast %cst_63 : f32 to vector<16x1xf32>
    %154 = arith.divf %152, %153 : vector<16x1xf32>
    %155 = vector.broadcast %154 : vector<16x1xf32> to vector<16x32xf32>
    %156 = arith.subf %146, %155 : vector<16x32xf32>
    %157 = arith.mulf %156, %156 : vector<16x32xf32>
    %cst_64 = arith.constant dense<0.000000e+00> : vector<16xf32>
    %158 = vector.multi_reduction <add>, %157, %cst_64 [1] : vector<16x32xf32> to vector<16xf32>
    %159 = vector.shape_cast %158 : vector<16xf32> to vector<16x1xf32>
    %cst_65 = arith.constant 3.200000e+01 : f32
    %160 = vector.broadcast %cst_65 : f32 to vector<16x1xf32>
    %161 = arith.divf %159, %160 : vector<16x1xf32>
    %162 = vector.broadcast %154 : vector<16x1xf32> to vector<16x32xf32>
    %163 = arith.subf %146, %162 : vector<16x32xf32>
    %cst_66 = arith.constant 9.99999974E-6 : f32
    %164 = vector.broadcast %cst_66 : f32 to vector<16x1xf32>
    %165 = arith.addf %161, %164 : vector<16x1xf32>
    %166 = math.rsqrt %165 : vector<16x1xf32>
    %167 = vector.broadcast %166 : vector<16x1xf32> to vector<16x32xf32>
    %168 = arith.mulf %163, %167 : vector<16x32xf32>
    %169 = vector.broadcast %148 : vector<1x32xf32> to vector<16x32xf32>
    %170 = arith.mulf %168, %169 : vector<16x32xf32>
    %171 = vector.broadcast %150 : vector<1x32xf32> to vector<16x32xf32>
    %172 = arith.addf %170, %171 : vector<16x32xf32>
    %c0_67 = arith.constant 0 : index
    %c0_68 = arith.constant 0 : index
    %c0_69 = arith.constant 0 : index
    %173 = vector.load %arg12[%c0_67, %c0_68, %c0_69] : memref<2x32x128xf32, #tpu.memory_space<vmem>>, vector<1x32x128xf32>
    %174 = vector.shape_cast %173 : vector<1x32x128xf32> to vector<32x128xf32>
    %cst_70 = arith.constant dense<0.000000e+00> : vector<16x128xf32>
    %175 = tpu.matmul %172, %174, %cst_70 {dimension_numbers = #tpu.dot_dimension_numbers<[1], [0], [0], [1], [0, 0, 1, 1], [], []>} : vector<16x32xf32>, vector<32x128xf32>, vector<16x128xf32> -> vector<16x128xf32>
    %c0_71 = arith.constant 0 : index
    %c0_72 = arith.constant 0 : index
    %c0_73 = arith.constant 0 : index
    %176 = vector.load %arg13[%c0_71, %c0_72, %c0_73] : memref<2x1x128xf32, #tpu.memory_space<vmem>>, vector<1x1x128xf32>
    %177 = vector.shape_cast %176 : vector<1x1x128xf32> to vector<1x128xf32>
    %178 = vector.broadcast %177 : vector<1x128xf32> to vector<16x128xf32>
    %179 = arith.addf %175, %178 : vector<16x128xf32>
    %cst_74 = arith.constant 0.000000e+00 : f32
    %180 = vector.broadcast %cst_74 : f32 to vector<16x128xf32>
    %181 = arith.maximumf %179, %180 : vector<16x128xf32>
    %c0_75 = arith.constant 0 : index
    %c0_76 = arith.constant 0 : index
    %c0_77 = arith.constant 0 : index
    %182 = vector.load %arg14[%c0_75, %c0_76, %c0_77] : memref<2x128x32xf32, #tpu.memory_space<vmem>>, vector<1x128x32xf32>
    %183 = vector.shape_cast %182 : vector<1x128x32xf32> to vector<128x32xf32>
    %cst_78 = arith.constant dense<0.000000e+00> : vector<16x32xf32>
    %184 = tpu.matmul %181, %183, %cst_78 {dimension_numbers = #tpu.dot_dimension_numbers<[1], [0], [0], [1], [0, 0, 1, 1], [], []>} : vector<16x128xf32>, vector<128x32xf32>, vector<16x32xf32> -> vector<16x32xf32>
    %c0_79 = arith.constant 0 : index
    %c0_80 = arith.constant 0 : index
    %c0_81 = arith.constant 0 : index
    %185 = vector.load %arg15[%c0_79, %c0_80, %c0_81] : memref<2x1x32xf32, #tpu.memory_space<vmem>>, vector<1x1x32xf32>
    %186 = vector.shape_cast %185 : vector<1x1x32xf32> to vector<1x32xf32>
    %187 = vector.broadcast %186 : vector<1x32xf32> to vector<16x32xf32>
    %188 = arith.addf %184, %187 : vector<16x32xf32>
    %189 = arith.addf %172, %188 : vector<16x32xf32>
    %c0_82 = arith.constant 0 : index
    %c0_83 = arith.constant 0 : index
    %c0_84 = arith.constant 0 : index
    %190 = vector.load %arg16[%c0_82, %c0_83, %c0_84] : memref<2x1x32xf32, #tpu.memory_space<vmem>>, vector<1x1x32xf32>
    %191 = vector.shape_cast %190 : vector<1x1x32xf32> to vector<1x32xf32>
    %c0_85 = arith.constant 0 : index
    %c0_86 = arith.constant 0 : index
    %c0_87 = arith.constant 0 : index
    %192 = vector.load %arg17[%c0_85, %c0_86, %c0_87] : memref<2x1x32xf32, #tpu.memory_space<vmem>>, vector<1x1x32xf32>
    %193 = vector.shape_cast %192 : vector<1x1x32xf32> to vector<1x32xf32>
    %cst_88 = arith.constant dense<0.000000e+00> : vector<16xf32>
    %194 = vector.multi_reduction <add>, %189, %cst_88 [1] : vector<16x32xf32> to vector<16xf32>
    %195 = vector.shape_cast %194 : vector<16xf32> to vector<16x1xf32>
    %cst_89 = arith.constant 3.200000e+01 : f32
    %196 = vector.broadcast %cst_89 : f32 to vector<16x1xf32>
    %197 = arith.divf %195, %196 : vector<16x1xf32>
    %198 = vector.broadcast %197 : vector<16x1xf32> to vector<16x32xf32>
    %199 = arith.subf %189, %198 : vector<16x32xf32>
    %200 = arith.mulf %199, %199 : vector<16x32xf32>
    %cst_90 = arith.constant dense<0.000000e+00> : vector<16xf32>
    %201 = vector.multi_reduction <add>, %200, %cst_90 [1] : vector<16x32xf32> to vector<16xf32>
    %202 = vector.shape_cast %201 : vector<16xf32> to vector<16x1xf32>
    %cst_91 = arith.constant 3.200000e+01 : f32
    %203 = vector.broadcast %cst_91 : f32 to vector<16x1xf32>
    %204 = arith.divf %202, %203 : vector<16x1xf32>
    %205 = vector.broadcast %197 : vector<16x1xf32> to vector<16x32xf32>
    %206 = arith.subf %189, %205 : vector<16x32xf32>
    %cst_92 = arith.constant 9.99999974E-6 : f32
    %207 = vector.broadcast %cst_92 : f32 to vector<16x1xf32>
    %208 = arith.addf %204, %207 : vector<16x1xf32>
    %209 = math.rsqrt %208 : vector<16x1xf32>
    %210 = vector.broadcast %209 : vector<16x1xf32> to vector<16x32xf32>
    %211 = arith.mulf %206, %210 : vector<16x32xf32>
    %212 = vector.broadcast %191 : vector<1x32xf32> to vector<16x32xf32>
    %213 = arith.mulf %211, %212 : vector<16x32xf32>
    %214 = vector.broadcast %193 : vector<1x32xf32> to vector<16x32xf32>
    %215 = arith.addf %213, %214 : vector<16x32xf32>
    %c1_93 = arith.constant 1 : index
    %c0_94 = arith.constant 0 : index
    %c0_95 = arith.constant 0 : index
    %216 = vector.load %arg6[%c1_93, %c0_94, %c0_95] : memref<2x32x96xf32, #tpu.memory_space<vmem>>, vector<1x32x96xf32>
    %217 = vector.shape_cast %216 : vector<1x32x96xf32> to vector<32x96xf32>
    %cst_96 = arith.constant dense<0.000000e+00> : vector<16x96xf32>
    %218 = tpu.matmul %215, %217, %cst_96 {dimension_numbers = #tpu.dot_dimension_numbers<[1], [0], [0], [1], [0, 0, 1, 1], [], []>} : vector<16x32xf32>, vector<32x96xf32>, vector<16x96xf32> -> vector<16x96xf32>
    %c1_97 = arith.constant 1 : index
    %c0_98 = arith.constant 0 : index
    %c0_99 = arith.constant 0 : index
    %219 = vector.load %arg7[%c1_97, %c0_98, %c0_99] : memref<2x1x96xf32, #tpu.memory_space<vmem>>, vector<1x1x96xf32>
    %220 = vector.shape_cast %219 : vector<1x1x96xf32> to vector<1x96xf32>
    %221 = vector.broadcast %220 : vector<1x96xf32> to vector<16x96xf32>
    %222 = arith.addf %218, %221 : vector<16x96xf32>
    %223 = vector.extract_strided_slice %222 {offsets = [0, 0], sizes = [16, 32], strides = [1, 1]} : vector<16x96xf32> to vector<16x32xf32>
    %224 = vector.shape_cast %223 : vector<16x32xf32> to vector<2x8x32xf32>
    %225 = vector.extract_strided_slice %222 {offsets = [0, 32], sizes = [16, 32], strides = [1, 1]} : vector<16x96xf32> to vector<16x32xf32>
    %226 = vector.shape_cast %225 : vector<16x32xf32> to vector<2x8x32xf32>
    %227 = vector.extract_strided_slice %222 {offsets = [0, 64], sizes = [16, 32], strides = [1, 1]} : vector<16x96xf32> to vector<16x32xf32>
    %228 = vector.shape_cast %227 : vector<16x32xf32> to vector<2x8x32xf32>
    %229 = vector.extract_strided_slice %224 {offsets = [0, 0, 0], sizes = [2, 8, 8], strides = [1, 1, 1]} : vector<2x8x32xf32> to vector<2x8x8xf32>
    %230 = vector.extract_strided_slice %226 {offsets = [0, 0, 0], sizes = [2, 8, 8], strides = [1, 1, 1]} : vector<2x8x32xf32> to vector<2x8x8xf32>
    %231 = vector.extract_strided_slice %228 {offsets = [0, 0, 0], sizes = [2, 8, 8], strides = [1, 1, 1]} : vector<2x8x32xf32> to vector<2x8x8xf32>
    "tpu.trace_start"() <{level = 10 : i32, message = "bqd,bkd->bqk"}> : () -> ()
    %cst_100 = arith.constant dense<0.000000e+00> : vector<2x8x8xf32>
    %232 = tpu.matmul %229, %230, %cst_100 {dimension_numbers = #tpu.dot_dimension_numbers<[2], [2], [1], [1], [0, 0, 0, 1, 1, 1], [0], [0]>} : vector<2x8x8xf32>, vector<2x8x8xf32>, vector<2x8x8xf32> -> vector<2x8x8xf32>
    "tpu.trace_stop"() : () -> ()
    %cst_101 = arith.constant 0.353553385 : f32
    %233 = vector.broadcast %cst_101 : f32 to vector<2x8x8xf32>
    %234 = arith.mulf %232, %233 : vector<2x8x8xf32>
    %235 = vector.broadcast %16 : vector<2x1x8xf32> to vector<2x8x8xf32>
    %236 = arith.addf %234, %235 : vector<2x8x8xf32>
    %cst_102 = arith.constant dense<0xFF800000> : vector<2x8xf32>
    %237 = vector.multi_reduction <maximumf>, %236, %cst_102 [2] : vector<2x8x8xf32> to vector<2x8xf32>
    %238 = vector.shape_cast %237 : vector<2x8xf32> to vector<2x8x1xf32>
    %239 = vector.broadcast %238 : vector<2x8x1xf32> to vector<2x8x8xf32>
    %240 = arith.subf %236, %239 : vector<2x8x8xf32>
    %241 = math.exp %240 : vector<2x8x8xf32>
    %cst_103 = arith.constant dense<0.000000e+00> : vector<2x8xf32>
    %242 = vector.multi_reduction <add>, %241, %cst_103 [2] : vector<2x8x8xf32> to vector<2x8xf32>
    %243 = vector.shape_cast %242 : vector<2x8xf32> to vector<2x8x1xf32>
    %244 = tpu.reciprocal %243 {approx = true} : vector<2x8x1xf32> -> vector<2x8x1xf32>
    %245 = vector.broadcast %244 : vector<2x8x1xf32> to vector<2x8x8xf32>
    %246 = arith.mulf %241, %245 : vector<2x8x8xf32>
    "tpu.trace_start"() <{level = 10 : i32, message = "bqk,bkd->bqd"}> : () -> ()
    %cst_104 = arith.constant dense<0.000000e+00> : vector<2x8x8xf32>
    %247 = tpu.matmul %246, %231, %cst_104 {dimension_numbers = #tpu.dot_dimension_numbers<[2], [1], [1], [2], [0, 0, 0, 1, 1, 2], [0], [0]>} : vector<2x8x8xf32>, vector<2x8x8xf32>, vector<2x8x8xf32> -> vector<2x8x8xf32>
    "tpu.trace_stop"() : () -> ()
    %248 = vector.extract_strided_slice %224 {offsets = [0, 0, 8], sizes = [2, 8, 8], strides = [1, 1, 1]} : vector<2x8x32xf32> to vector<2x8x8xf32>
    %249 = vector.extract_strided_slice %226 {offsets = [0, 0, 8], sizes = [2, 8, 8], strides = [1, 1, 1]} : vector<2x8x32xf32> to vector<2x8x8xf32>
    %250 = vector.extract_strided_slice %228 {offsets = [0, 0, 8], sizes = [2, 8, 8], strides = [1, 1, 1]} : vector<2x8x32xf32> to vector<2x8x8xf32>
    "tpu.trace_start"() <{level = 10 : i32, message = "bqd,bkd->bqk"}> : () -> ()
    %cst_105 = arith.constant dense<0.000000e+00> : vector<2x8x8xf32>
    %251 = tpu.matmul %248, %249, %cst_105 {dimension_numbers = #tpu.dot_dimension_numbers<[2], [2], [1], [1], [0, 0, 0, 1, 1, 1], [0], [0]>} : vector<2x8x8xf32>, vector<2x8x8xf32>, vector<2x8x8xf32> -> vector<2x8x8xf32>
    "tpu.trace_stop"() : () -> ()
    %cst_106 = arith.constant 0.353553385 : f32
    %252 = vector.broadcast %cst_106 : f32 to vector<2x8x8xf32>
    %253 = arith.mulf %251, %252 : vector<2x8x8xf32>
    %254 = vector.broadcast %16 : vector<2x1x8xf32> to vector<2x8x8xf32>
    %255 = arith.addf %253, %254 : vector<2x8x8xf32>
    %cst_107 = arith.constant dense<0xFF800000> : vector<2x8xf32>
    %256 = vector.multi_reduction <maximumf>, %255, %cst_107 [2] : vector<2x8x8xf32> to vector<2x8xf32>
    %257 = vector.shape_cast %256 : vector<2x8xf32> to vector<2x8x1xf32>
    %258 = vector.broadcast %257 : vector<2x8x1xf32> to vector<2x8x8xf32>
    %259 = arith.subf %255, %258 : vector<2x8x8xf32>
    %260 = math.exp %259 : vector<2x8x8xf32>
    %cst_108 = arith.constant dense<0.000000e+00> : vector<2x8xf32>
    %261 = vector.multi_reduction <add>, %260, %cst_108 [2] : vector<2x8x8xf32> to vector<2x8xf32>
    %262 = vector.shape_cast %261 : vector<2x8xf32> to vector<2x8x1xf32>
    %263 = tpu.reciprocal %262 {approx = true} : vector<2x8x1xf32> -> vector<2x8x1xf32>
    %264 = vector.broadcast %263 : vector<2x8x1xf32> to vector<2x8x8xf32>
    %265 = arith.mulf %260, %264 : vector<2x8x8xf32>
    "tpu.trace_start"() <{level = 10 : i32, message = "bqk,bkd->bqd"}> : () -> ()
    %cst_109 = arith.constant dense<0.000000e+00> : vector<2x8x8xf32>
    %266 = tpu.matmul %265, %250, %cst_109 {dimension_numbers = #tpu.dot_dimension_numbers<[2], [1], [1], [2], [0, 0, 0, 1, 1, 2], [0], [0]>} : vector<2x8x8xf32>, vector<2x8x8xf32>, vector<2x8x8xf32> -> vector<2x8x8xf32>
    "tpu.trace_stop"() : () -> ()
    %267 = vector.extract_strided_slice %224 {offsets = [0, 0, 16], sizes = [2, 8, 8], strides = [1, 1, 1]} : vector<2x8x32xf32> to vector<2x8x8xf32>
    %268 = vector.extract_strided_slice %226 {offsets = [0, 0, 16], sizes = [2, 8, 8], strides = [1, 1, 1]} : vector<2x8x32xf32> to vector<2x8x8xf32>
    %269 = vector.extract_strided_slice %228 {offsets = [0, 0, 16], sizes = [2, 8, 8], strides = [1, 1, 1]} : vector<2x8x32xf32> to vector<2x8x8xf32>
    "tpu.trace_start"() <{level = 10 : i32, message = "bqd,bkd->bqk"}> : () -> ()
    %cst_110 = arith.constant dense<0.000000e+00> : vector<2x8x8xf32>
    %270 = tpu.matmul %267, %268, %cst_110 {dimension_numbers = #tpu.dot_dimension_numbers<[2], [2], [1], [1], [0, 0, 0, 1, 1, 1], [0], [0]>} : vector<2x8x8xf32>, vector<2x8x8xf32>, vector<2x8x8xf32> -> vector<2x8x8xf32>
    "tpu.trace_stop"() : () -> ()
    %cst_111 = arith.constant 0.353553385 : f32
    %271 = vector.broadcast %cst_111 : f32 to vector<2x8x8xf32>
    %272 = arith.mulf %270, %271 : vector<2x8x8xf32>
    %273 = vector.broadcast %16 : vector<2x1x8xf32> to vector<2x8x8xf32>
    %274 = arith.addf %272, %273 : vector<2x8x8xf32>
    %cst_112 = arith.constant dense<0xFF800000> : vector<2x8xf32>
    %275 = vector.multi_reduction <maximumf>, %274, %cst_112 [2] : vector<2x8x8xf32> to vector<2x8xf32>
    %276 = vector.shape_cast %275 : vector<2x8xf32> to vector<2x8x1xf32>
    %277 = vector.broadcast %276 : vector<2x8x1xf32> to vector<2x8x8xf32>
    %278 = arith.subf %274, %277 : vector<2x8x8xf32>
    %279 = math.exp %278 : vector<2x8x8xf32>
    %cst_113 = arith.constant dense<0.000000e+00> : vector<2x8xf32>
    %280 = vector.multi_reduction <add>, %279, %cst_113 [2] : vector<2x8x8xf32> to vector<2x8xf32>
    %281 = vector.shape_cast %280 : vector<2x8xf32> to vector<2x8x1xf32>
    %282 = tpu.reciprocal %281 {approx = true} : vector<2x8x1xf32> -> vector<2x8x1xf32>
    %283 = vector.broadcast %282 : vector<2x8x1xf32> to vector<2x8x8xf32>
    %284 = arith.mulf %279, %283 : vector<2x8x8xf32>
    "tpu.trace_start"() <{level = 10 : i32, message = "bqk,bkd->bqd"}> : () -> ()
    %cst_114 = arith.constant dense<0.000000e+00> : vector<2x8x8xf32>
    %285 = tpu.matmul %284, %269, %cst_114 {dimension_numbers = #tpu.dot_dimension_numbers<[2], [1], [1], [2], [0, 0, 0, 1, 1, 2], [0], [0]>} : vector<2x8x8xf32>, vector<2x8x8xf32>, vector<2x8x8xf32> -> vector<2x8x8xf32>
    "tpu.trace_stop"() : () -> ()
    %286 = vector.extract_strided_slice %224 {offsets = [0, 0, 24], sizes = [2, 8, 8], strides = [1, 1, 1]} : vector<2x8x32xf32> to vector<2x8x8xf32>
    %287 = vector.extract_strided_slice %226 {offsets = [0, 0, 24], sizes = [2, 8, 8], strides = [1, 1, 1]} : vector<2x8x32xf32> to vector<2x8x8xf32>
    %288 = vector.extract_strided_slice %228 {offsets = [0, 0, 24], sizes = [2, 8, 8], strides = [1, 1, 1]} : vector<2x8x32xf32> to vector<2x8x8xf32>
    "tpu.trace_start"() <{level = 10 : i32, message = "bqd,bkd->bqk"}> : () -> ()
    %cst_115 = arith.constant dense<0.000000e+00> : vector<2x8x8xf32>
    %289 = tpu.matmul %286, %287, %cst_115 {dimension_numbers = #tpu.dot_dimension_numbers<[2], [2], [1], [1], [0, 0, 0, 1, 1, 1], [0], [0]>} : vector<2x8x8xf32>, vector<2x8x8xf32>, vector<2x8x8xf32> -> vector<2x8x8xf32>
    "tpu.trace_stop"() : () -> ()
    %cst_116 = arith.constant 0.353553385 : f32
    %290 = vector.broadcast %cst_116 : f32 to vector<2x8x8xf32>
    %291 = arith.mulf %289, %290 : vector<2x8x8xf32>
    %292 = vector.broadcast %16 : vector<2x1x8xf32> to vector<2x8x8xf32>
    %293 = arith.addf %291, %292 : vector<2x8x8xf32>
    %cst_117 = arith.constant dense<0xFF800000> : vector<2x8xf32>
    %294 = vector.multi_reduction <maximumf>, %293, %cst_117 [2] : vector<2x8x8xf32> to vector<2x8xf32>
    %295 = vector.shape_cast %294 : vector<2x8xf32> to vector<2x8x1xf32>
    %296 = vector.broadcast %295 : vector<2x8x1xf32> to vector<2x8x8xf32>
    %297 = arith.subf %293, %296 : vector<2x8x8xf32>
    %298 = math.exp %297 : vector<2x8x8xf32>
    %cst_118 = arith.constant dense<0.000000e+00> : vector<2x8xf32>
    %299 = vector.multi_reduction <add>, %298, %cst_118 [2] : vector<2x8x8xf32> to vector<2x8xf32>
    %300 = vector.shape_cast %299 : vector<2x8xf32> to vector<2x8x1xf32>
    %301 = tpu.reciprocal %300 {approx = true} : vector<2x8x1xf32> -> vector<2x8x1xf32>
    %302 = vector.broadcast %301 : vector<2x8x1xf32> to vector<2x8x8xf32>
    %303 = arith.mulf %298, %302 : vector<2x8x8xf32>
    "tpu.trace_start"() <{level = 10 : i32, message = "bqk,bkd->bqd"}> : () -> ()
    %cst_119 = arith.constant dense<0.000000e+00> : vector<2x8x8xf32>
    %304 = tpu.matmul %303, %288, %cst_119 {dimension_numbers = #tpu.dot_dimension_numbers<[2], [1], [1], [2], [0, 0, 0, 1, 1, 2], [0], [0]>} : vector<2x8x8xf32>, vector<2x8x8xf32>, vector<2x8x8xf32> -> vector<2x8x8xf32>
    "tpu.trace_stop"() : () -> ()
    %305 = tpu.concatenate %247, %266, %285, %304 in 2 : vector<2x8x8xf32>, vector<2x8x8xf32>, vector<2x8x8xf32>, vector<2x8x8xf32> -> vector<2x8x32xf32>
    %306 = vector.shape_cast %305 : vector<2x8x32xf32> to vector<16x32xf32>
    %c1_120 = arith.constant 1 : index
    %c0_121 = arith.constant 0 : index
    %c0_122 = arith.constant 0 : index
    %307 = vector.load %arg8[%c1_120, %c0_121, %c0_122] : memref<2x32x32xf32, #tpu.memory_space<vmem>>, vector<1x32x32xf32>
    %308 = vector.shape_cast %307 : vector<1x32x32xf32> to vector<32x32xf32>
    %cst_123 = arith.constant dense<0.000000e+00> : vector<16x32xf32>
    %309 = tpu.matmul %306, %308, %cst_123 {dimension_numbers = #tpu.dot_dimension_numbers<[1], [0], [0], [1], [0, 0, 1, 1], [], []>} : vector<16x32xf32>, vector<32x32xf32>, vector<16x32xf32> -> vector<16x32xf32>
    %c1_124 = arith.constant 1 : index
    %c0_125 = arith.constant 0 : index
    %c0_126 = arith.constant 0 : index
    %310 = vector.load %arg9[%c1_124, %c0_125, %c0_126] : memref<2x1x32xf32, #tpu.memory_space<vmem>>, vector<1x1x32xf32>
    %311 = vector.shape_cast %310 : vector<1x1x32xf32> to vector<1x32xf32>
    %312 = vector.broadcast %311 : vector<1x32xf32> to vector<16x32xf32>
    %313 = arith.addf %309, %312 : vector<16x32xf32>
    %314 = arith.addf %215, %313 : vector<16x32xf32>
    %c1_127 = arith.constant 1 : index
    %c0_128 = arith.constant 0 : index
    %c0_129 = arith.constant 0 : index
    %315 = vector.load %arg10[%c1_127, %c0_128, %c0_129] : memref<2x1x32xf32, #tpu.memory_space<vmem>>, vector<1x1x32xf32>
    %316 = vector.shape_cast %315 : vector<1x1x32xf32> to vector<1x32xf32>
    %c1_130 = arith.constant 1 : index
    %c0_131 = arith.constant 0 : index
    %c0_132 = arith.constant 0 : index
    %317 = vector.load %arg11[%c1_130, %c0_131, %c0_132] : memref<2x1x32xf32, #tpu.memory_space<vmem>>, vector<1x1x32xf32>
    %318 = vector.shape_cast %317 : vector<1x1x32xf32> to vector<1x32xf32>
    %cst_133 = arith.constant dense<0.000000e+00> : vector<16xf32>
    %319 = vector.multi_reduction <add>, %314, %cst_133 [1] : vector<16x32xf32> to vector<16xf32>
    %320 = vector.shape_cast %319 : vector<16xf32> to vector<16x1xf32>
    %cst_134 = arith.constant 3.200000e+01 : f32
    %321 = vector.broadcast %cst_134 : f32 to vector<16x1xf32>
    %322 = arith.divf %320, %321 : vector<16x1xf32>
    %323 = vector.broadcast %322 : vector<16x1xf32> to vector<16x32xf32>
    %324 = arith.subf %314, %323 : vector<16x32xf32>
    %325 = arith.mulf %324, %324 : vector<16x32xf32>
    %cst_135 = arith.constant dense<0.000000e+00> : vector<16xf32>
    %326 = vector.multi_reduction <add>, %325, %cst_135 [1] : vector<16x32xf32> to vector<16xf32>
    %327 = vector.shape_cast %326 : vector<16xf32> to vector<16x1xf32>
    %cst_136 = arith.constant 3.200000e+01 : f32
    %328 = vector.broadcast %cst_136 : f32 to vector<16x1xf32>
    %329 = arith.divf %327, %328 : vector<16x1xf32>
    %330 = vector.broadcast %322 : vector<16x1xf32> to vector<16x32xf32>
    %331 = arith.subf %314, %330 : vector<16x32xf32>
    %cst_137 = arith.constant 9.99999974E-6 : f32
    %332 = vector.broadcast %cst_137 : f32 to vector<16x1xf32>
    %333 = arith.addf %329, %332 : vector<16x1xf32>
    %334 = math.rsqrt %333 : vector<16x1xf32>
    %335 = vector.broadcast %334 : vector<16x1xf32> to vector<16x32xf32>
    %336 = arith.mulf %331, %335 : vector<16x32xf32>
    %337 = vector.broadcast %316 : vector<1x32xf32> to vector<16x32xf32>
    %338 = arith.mulf %336, %337 : vector<16x32xf32>
    %339 = vector.broadcast %318 : vector<1x32xf32> to vector<16x32xf32>
    %340 = arith.addf %338, %339 : vector<16x32xf32>
    %c1_138 = arith.constant 1 : index
    %c0_139 = arith.constant 0 : index
    %c0_140 = arith.constant 0 : index
    %341 = vector.load %arg12[%c1_138, %c0_139, %c0_140] : memref<2x32x128xf32, #tpu.memory_space<vmem>>, vector<1x32x128xf32>
    %342 = vector.shape_cast %341 : vector<1x32x128xf32> to vector<32x128xf32>
    %cst_141 = arith.constant dense<0.000000e+00> : vector<16x128xf32>
    %343 = tpu.matmul %340, %342, %cst_141 {dimension_numbers = #tpu.dot_dimension_numbers<[1], [0], [0], [1], [0, 0, 1, 1], [], []>} : vector<16x32xf32>, vector<32x128xf32>, vector<16x128xf32> -> vector<16x128xf32>
    %c1_142 = arith.constant 1 : index
    %c0_143 = arith.constant 0 : index
    %c0_144 = arith.constant 0 : index
    %344 = vector.load %arg13[%c1_142, %c0_143, %c0_144] : memref<2x1x128xf32, #tpu.memory_space<vmem>>, vector<1x1x128xf32>
    %345 = vector.shape_cast %344 : vector<1x1x128xf32> to vector<1x128xf32>
    %346 = vector.broadcast %345 : vector<1x128xf32> to vector<16x128xf32>
    %347 = arith.addf %343, %346 : vector<16x128xf32>
    %cst_145 = arith.constant 0.000000e+00 : f32
    %348 = vector.broadcast %cst_145 : f32 to vector<16x128xf32>
    %349 = arith.maximumf %347, %348 : vector<16x128xf32>
    %c1_146 = arith.constant 1 : index
    %c0_147 = arith.constant 0 : index
    %c0_148 = arith.constant 0 : index
    %350 = vector.load %arg14[%c1_146, %c0_147, %c0_148] : memref<2x128x32xf32, #tpu.memory_space<vmem>>, vector<1x128x32xf32>
    %351 = vector.shape_cast %350 : vector<1x128x32xf32> to vector<128x32xf32>
    %cst_149 = arith.constant dense<0.000000e+00> : vector<16x32xf32>
    %352 = tpu.matmul %349, %351, %cst_149 {dimension_numbers = #tpu.dot_dimension_numbers<[1], [0], [0], [1], [0, 0, 1, 1], [], []>} : vector<16x128xf32>, vector<128x32xf32>, vector<16x32xf32> -> vector<16x32xf32>
    %c1_150 = arith.constant 1 : index
    %c0_151 = arith.constant 0 : index
    %c0_152 = arith.constant 0 : index
    %353 = vector.load %arg15[%c1_150, %c0_151, %c0_152] : memref<2x1x32xf32, #tpu.memory_space<vmem>>, vector<1x1x32xf32>
    %354 = vector.shape_cast %353 : vector<1x1x32xf32> to vector<1x32xf32>
    %355 = vector.broadcast %354 : vector<1x32xf32> to vector<16x32xf32>
    %356 = arith.addf %352, %355 : vector<16x32xf32>
    %357 = arith.addf %340, %356 : vector<16x32xf32>
    %c1_153 = arith.constant 1 : index
    %c0_154 = arith.constant 0 : index
    %c0_155 = arith.constant 0 : index
    %358 = vector.load %arg16[%c1_153, %c0_154, %c0_155] : memref<2x1x32xf32, #tpu.memory_space<vmem>>, vector<1x1x32xf32>
    %359 = vector.shape_cast %358 : vector<1x1x32xf32> to vector<1x32xf32>
    %c1_156 = arith.constant 1 : index
    %c0_157 = arith.constant 0 : index
    %c0_158 = arith.constant 0 : index
    %360 = vector.load %arg17[%c1_156, %c0_157, %c0_158] : memref<2x1x32xf32, #tpu.memory_space<vmem>>, vector<1x1x32xf32>
    %361 = vector.shape_cast %360 : vector<1x1x32xf32> to vector<1x32xf32>
    %cst_159 = arith.constant dense<0.000000e+00> : vector<16xf32>
    %362 = vector.multi_reduction <add>, %357, %cst_159 [1] : vector<16x32xf32> to vector<16xf32>
    %363 = vector.shape_cast %362 : vector<16xf32> to vector<16x1xf32>
    %cst_160 = arith.constant 3.200000e+01 : f32
    %364 = vector.broadcast %cst_160 : f32 to vector<16x1xf32>
    %365 = arith.divf %363, %364 : vector<16x1xf32>
    %366 = vector.broadcast %365 : vector<16x1xf32> to vector<16x32xf32>
    %367 = arith.subf %357, %366 : vector<16x32xf32>
    %368 = arith.mulf %367, %367 : vector<16x32xf32>
    %cst_161 = arith.constant dense<0.000000e+00> : vector<16xf32>
    %369 = vector.multi_reduction <add>, %368, %cst_161 [1] : vector<16x32xf32> to vector<16xf32>
    %370 = vector.shape_cast %369 : vector<16xf32> to vector<16x1xf32>
    %cst_162 = arith.constant 3.200000e+01 : f32
    %371 = vector.broadcast %cst_162 : f32 to vector<16x1xf32>
    %372 = arith.divf %370, %371 : vector<16x1xf32>
    %373 = vector.broadcast %365 : vector<16x1xf32> to vector<16x32xf32>
    %374 = arith.subf %357, %373 : vector<16x32xf32>
    %cst_163 = arith.constant 9.99999974E-6 : f32
    %375 = vector.broadcast %cst_163 : f32 to vector<16x1xf32>
    %376 = arith.addf %372, %375 : vector<16x1xf32>
    %377 = math.rsqrt %376 : vector<16x1xf32>
    %378 = vector.broadcast %377 : vector<16x1xf32> to vector<16x32xf32>
    %379 = arith.mulf %374, %378 : vector<16x32xf32>
    %380 = vector.broadcast %359 : vector<1x32xf32> to vector<16x32xf32>
    %381 = arith.mulf %379, %380 : vector<16x32xf32>
    %382 = vector.broadcast %361 : vector<1x32xf32> to vector<16x32xf32>
    %383 = arith.addf %381, %382 : vector<16x32xf32>
    %cst_164 = arith.constant dense<0.000000e+00> : vector<2x32xf32>
    %384 = tpu.matmul %37, %383, %cst_164 {dimension_numbers = #tpu.dot_dimension_numbers<[1], [0], [0], [1], [0, 0, 1, 1], [], []>} : vector<2x16xf32>, vector<16x32xf32>, vector<2x32xf32> -> vector<2x32xf32>
    %c0_165 = arith.constant 0 : index
    %c0_166 = arith.constant 0 : index
    %385 = vector.load %arg18[%c0_165, %c0_166] : memref<32x2xf32, #tpu.memory_space<vmem>>, vector<32x2xf32>
    %cst_167 = arith.constant dense<0.000000e+00> : vector<2x2xf32>
    %386 = tpu.matmul %384, %385, %cst_167 {dimension_numbers = #tpu.dot_dimension_numbers<[1], [0], [0], [1], [0, 0, 1, 1], [], []>} : vector<2x32xf32>, vector<32x2xf32>, vector<2x2xf32> -> vector<2x2xf32>
    %c0_168 = arith.constant 0 : index
    %c0_169 = arith.constant 0 : index
    %387 = vector.load %arg19[%c0_168, %c0_169] : memref<1x2xf32, #tpu.memory_space<vmem>>, vector<1x2xf32>
    %388 = vector.broadcast %387 : vector<1x2xf32> to vector<2x2xf32>
    %389 = arith.addf %386, %388 : vector<2x2xf32>
    %c0_170 = arith.constant 0 : index
    %c0_171 = arith.constant 0 : index
    %390 = vector.load %arg20[%c0_170, %c0_171] : memref<2x2xf32, #tpu.memory_space<vmem>>, vector<2x2xf32>
    tpu.vector_store %arg20[%c0_170, %c0_171], %389 {strides = array<i32>} : memref<2x2xf32, #tpu.memory_space<vmem>>, vector<2x2xf32>,
    return
  }
  func.func @transform_0(%arg0: i32, %arg1: memref<2xi32, #tpu.memory_space<smem>>) -> (i32, i32, i32) {
    %c0_i32 = arith.constant 0 : i32
    %c0_i32_0 = arith.constant 0 : i32
    %c0_i32_1 = arith.constant 0 : i32
    %c0_i32_2 = arith.constant 0 : i32
    return %c0_i32, %c0_i32_0, %c0_i32_1 : i32, i32, i32
  }
  func.func @transform_1(%arg0: i32, %arg1: memref<2xi32, #tpu.memory_space<smem>>) -> (i32, i32) {
    %c0_i32 = arith.constant 0 : i32
    %c0_i32_0 = arith.constant 0 : i32
    %c0_i32_1 = arith.constant 0 : i32
    return %c0_i32, %c0_i32_0 : i32, i32
  }
  func.func @transform_2(%arg0: i32, %arg1: memref<2xi32, #tpu.memory_space<smem>>) -> (i32, i32) {
    %c0_i32 = arith.constant 0 : i32
    %c0_i32_0 = arith.constant 0 : i32
    %c0_i32_1 = arith.constant 0 : i32
    return %c0_i32, %c0_i32_0 : i32, i32
  }
  func.func @transform_3(%arg0: i32, %arg1: memref<2xi32, #tpu.memory_space<smem>>) -> (i32, i32) {
    %c0_i32 = arith.constant 0 : i32
    %c0_i32_0 = arith.constant 0 : i32
    %c0_i32_1 = arith.constant 0 : i32
    return %c0_i32, %c0_i32_0 : i32, i32
  }
  func.func @transform_4(%arg0: i32, %arg1: memref<2xi32, #tpu.memory_space<smem>>) -> (i32, i32, i32) {
    %c0_i32 = arith.constant 0 : i32
    %c0_i32_0 = arith.constant 0 : i32
    %c0_i32_1 = arith.constant 0 : i32
    %c0_i32_2 = arith.constant 0 : i32
    return %c0_i32, %c0_i32_0, %c0_i32_1 : i32, i32, i32
  }
  func.func @transform_5(%arg0: i32, %arg1: memref<2xi32, #tpu.memory_space<smem>>) -> (i32, i32, i32) {
    %c0_i32 = arith.constant 0 : i32
    %c0_i32_0 = arith.constant 0 : i32
    %c0_i32_1 = arith.constant 0 : i32
    %c0_i32_2 = arith.constant 0 : i32
    return %c0_i32, %c0_i32_0, %c0_i32_1 : i32, i32, i32
  }
  func.func @transform_6(%arg0: i32, %arg1: memref<2xi32, #tpu.memory_space<smem>>) -> (i32, i32, i32) {
    %c0_i32 = arith.constant 0 : i32
    %c0_i32_0 = arith.constant 0 : i32
    %c0_i32_1 = arith.constant 0 : i32
    %c0_i32_2 = arith.constant 0 : i32
    return %c0_i32, %c0_i32_0, %c0_i32_1 : i32, i32, i32
  }
  func.func @transform_7(%arg0: i32, %arg1: memref<2xi32, #tpu.memory_space<smem>>) -> (i32, i32, i32) {
    %c0_i32 = arith.constant 0 : i32
    %c0_i32_0 = arith.constant 0 : i32
    %c0_i32_1 = arith.constant 0 : i32
    %c0_i32_2 = arith.constant 0 : i32
    return %c0_i32, %c0_i32_0, %c0_i32_1 : i32, i32, i32
  }
  func.func @transform_8(%arg0: i32, %arg1: memref<2xi32, #tpu.memory_space<smem>>) -> (i32, i32, i32) {
    %c0_i32 = arith.constant 0 : i32
    %c0_i32_0 = arith.constant 0 : i32
    %c0_i32_1 = arith.constant 0 : i32
    %c0_i32_2 = arith.constant 0 : i32
    return %c0_i32, %c0_i32_0, %c0_i32_1 : i32, i32, i32
  }
  func.func @transform_9(%arg0: i32, %arg1: memref<2xi32, #tpu.memory_space<smem>>) -> (i32, i32, i32) {
    %c0_i32 = arith.constant 0 : i32
    %c0_i32_0 = arith.constant 0 : i32
    %c0_i32_1 = arith.constant 0 : i32
    %c0_i32_2 = arith.constant 0 : i32
    return %c0_i32, %c0_i32_0, %c0_i32_1 : i32, i32, i32
  }
  func.func @transform_10(%arg0: i32, %arg1: memref<2xi32, #tpu.memory_space<smem>>) -> (i32, i32, i32) {
    %c0_i32 = arith.constant 0 : i32
    %c0_i32_0 = arith.constant 0 : i32
    %c0_i32_1 = arith.constant 0 : i32
    %c0_i32_2 = arith.constant 0 : i32
    return %c0_i32, %c0_i32_0, %c0_i32_1 : i32, i32, i32
  }
  func.func @transform_11(%arg0: i32, %arg1: memref<2xi32, #tpu.memory_space<smem>>) -> (i32, i32, i32) {
    %c0_i32 = arith.constant 0 : i32
    %c0_i32_0 = arith.constant 0 : i32
    %c0_i32_1 = arith.constant 0 : i32
    %c0_i32_2 = arith.constant 0 : i32
    return %c0_i32, %c0_i32_0, %c0_i32_1 : i32, i32, i32
  }
  func.func @transform_12(%arg0: i32, %arg1: memref<2xi32, #tpu.memory_space<smem>>) -> (i32, i32, i32) {
    %c0_i32 = arith.constant 0 : i32
    %c0_i32_0 = arith.constant 0 : i32
    %c0_i32_1 = arith.constant 0 : i32
    %c0_i32_2 = arith.constant 0 : i32
    return %c0_i32, %c0_i32_0, %c0_i32_1 : i32, i32, i32
  }
  func.func @transform_13(%arg0: i32, %arg1: memref<2xi32, #tpu.memory_space<smem>>) -> (i32, i32, i32) {
    %c0_i32 = arith.constant 0 : i32
    %c0_i32_0 = arith.constant 0 : i32
    %c0_i32_1 = arith.constant 0 : i32
    %c0_i32_2 = arith.constant 0 : i32
    return %c0_i32, %c0_i32_0, %c0_i32_1 : i32, i32, i32
  }
  func.func @transform_14(%arg0: i32, %arg1: memref<2xi32, #tpu.memory_space<smem>>) -> (i32, i32, i32) {
    %c0_i32 = arith.constant 0 : i32
    %c0_i32_0 = arith.constant 0 : i32
    %c0_i32_1 = arith.constant 0 : i32
    %c0_i32_2 = arith.constant 0 : i32
    return %c0_i32, %c0_i32_0, %c0_i32_1 : i32, i32, i32
  }
  func.func @transform_15(%arg0: i32, %arg1: memref<2xi32, #tpu.memory_space<smem>>) -> (i32, i32, i32) {
    %c0_i32 = arith.constant 0 : i32
    %c0_i32_0 = arith.constant 0 : i32
    %c0_i32_1 = arith.constant 0 : i32
    %c0_i32_2 = arith.constant 0 : i32
    return %c0_i32, %c0_i32_0, %c0_i32_1 : i32, i32, i32
  }
  func.func @transform_16(%arg0: i32, %arg1: memref<2xi32, #tpu.memory_space<smem>>) -> (i32, i32) {
    %c0_i32 = arith.constant 0 : i32
    %c0_i32_0 = arith.constant 0 : i32
    %c0_i32_1 = arith.constant 0 : i32
    return %c0_i32, %c0_i32_0 : i32, i32
  }
  func.func @transform_17(%arg0: i32, %arg1: memref<2xi32, #tpu.memory_space<smem>>) -> (i32, i32) {
    %c0_i32 = arith.constant 0 : i32
    %c0_i32_0 = arith.constant 0 : i32
    %c0_i32_1 = arith.constant 0 : i32
    return %c0_i32, %c0_i32_0 : i32, i32
  }
  func.func @transform_18(%arg0: i32, %arg1: memref<2xi32, #tpu.memory_space<smem>>) -> (i32, i32) {
    %c0_i32 = arith.constant 0 : i32
    %c0_i32_0 = arith.constant 0 : i32
    %c0_i32_1 = arith.constant 0 : i32
    return %c0_i32, %c0_i32_0 : i32, i32
  }
}

</mosaic_0001>

<bundles_post_ra>
// kernel: tpu_custom_call.1
= control target key start
LH: loop header
LB: loop body
LE: loop exit
PB: predicated region body
PF: predicated region fallthrough
CT: control target
= control target key end

     0   :  { %s2178_s21 = smov [#allocation3]   ;;  %s2883_s0 = inlined_call_operand.vmem [shape: s32[2], index: 0, kind: input, shape index: {}]   ;;  %s2884_s1 = inlined_call_operand.vmem [shape: f32[2,8,16], index: 1, kind: input, shape index: {}]   ;;  %s2885_s2 = inlined_call_operand.vmem [shape: f32[16,32], index: 2, kind: input, shape index: {}]   ;;  %s2886_s3 = inlined_call_operand.vmem [shape: f32[1,32], index: 3, kind: input, shape index: {}]   ;;  %s2887_s4 = inlined_call_operand.vmem [shape: f32[8,32], index: 4, kind: input, shape index: {}]   ;;  %s2888_s5 = inlined_call_operand.vmem [shape: f32[2,32,96], index: 5, kind: input, shape index: {}]   ;;  %s2889_s6 = inlined_call_operand.vmem [shape: f32[2,1,96], index: 6, kind: input, shape index: {}]   ;;  %s2890_s7 = inlined_call_operand.vmem [shape: f32[2,32,32], index: 7, kind: input, shape index: {}]   ;;  %s2891_s8 = inlined_call_operand.vmem [shape: f32[2,1,32], index: 8, kind: input, shape index: {}]   ;;  %s2892_s9 = inlined_call_operand.vmem [shape: f32[2,1,32], index: 9, kind: input, shape index: {}]   ;;  %s2893_s10 = inlined_call_operand.vmem [shape: f32[2,1,32], index: 10, kind: input, shape index: {}]   ;;  %s2894_s11 = inlined_call_operand.vmem [shape: f32[2,32,128], index: 11, kind: input, shape index: {}]   ;;  %s2895_s12 = inlined_call_operand.vmem [shape: f32[2,1,128], index: 12, kind: input, shape index: {}]   ;;  %s2896_s13 = inlined_call_operand.vmem [shape: f32[2,128,32], index: 13, kind: input, shape index: {}]   ;;  %s2897_s14 = inlined_call_operand.vmem [shape: f32[2,1,32], index: 14, kind: input, shape index: {}]   ;;  %s2898_s15 = inlined_call_operand.vmem [shape: f32[2,1,32], index: 15, kind: input, shape index: {}]   ;;  %s2899_s16 = inlined_call_operand.vmem [shape: f32[2,1,32], index: 16, kind: input, shape index: {}]   ;;  %s2900_s17 = inlined_call_operand.vmem [shape: f32[32,2], index: 17, kind: input, shape index: {}]   ;;  %s2901_s18 = inlined_call_operand.vmem [shape: f32[1,2], index: 18, kind: input, shape index: {}]   ;;  %s2902_s19 = inlined_call_operand.hbm [shape: f32[2,2], index: 19, kind: output, shape index: {}]  }
   0x1   :  { %2921 = sst [smem:[#allocation8_spill]] %s2883_s0 }
   0x2   :  { %2922 = sst [smem:[#allocation9_spill]] %s2884_s1 }
   0x3   :  { %2923 = sst [smem:[#allocation10_spill]] %s2885_s2 }
   0x4   :  { %2924 = sst [smem:[#allocation11_spill]] %s2886_s3 }
   0x5   :  { %2925 = sst [smem:[#allocation12_spill]] %s2895_s12 }
   0x6   :  { %s2926_s20 = sld [smem:[#allocation8_spill]] }
   0xc   :  { %s25_s12 = sshll.u32 %s2926_s20, 4  ;;  %s26_s12 = int_to_ptr.vmem [resolvable:$true] %s25_s12 }
   0xd   :  { %28 = dma.vmem_to_smem %s26_s12, 16, %s2178_s21, [#allocation2] }
   0xe   :  { %2174 = dma.done.wait [#allocation2], 16 }
   0xf   :  { %2175 = vsyncadd [#allocation2], 4294967280 }
  0x10   :  { %31 = sfence }
  0x11   :  { %s2927_s2 = sld [smem:[#allocation10_spill]]  ;;  %vm99_vm0 = vcmask 130048   ;;  %v135_v3 = vld [vmem:[%s2888_s5 + $0x18] sm:$0xff] }
  0x12   :  { %s2928_s26 = sld [smem:[#allocation9_spill]]  ;;  %2000 = vmatpush.msra.mxu1 %v135_v3 }
  0x17   :  { %v94_v0 = vld [vmem:[%s2927_s2 + $0x8] sm:$0xff]  ;;  %v93_v1 = vld [vmem:[%s2927_s2] sm:$0xff] }
  0x18   :  { %120 = vmatpush.msra.mxu0 %v94_v0  ;;  %v91_v2 = vld [vmem:[%s2928_s26] sm:$0xff] }
  0x1a   :  { %121 = vmatpush.msra.mxu0 %v93_v1 }
  0x1b   :  { %1900 = vmatmul.msk.f32.vlgmr.msra.gmra.mxu0 %vm99_vm0, %v91_v2 }
  0x1c   :  { %159 = vmatpush.msrb.mxu0 %v135_v3 }
  0x1d   :  { %32 = vsyncpa [#allocation5], 0  ;;  %v92_v4 = vld [vmem:[%s2928_s26 + $0x8] sm:$0xff]  ;;  %v134_v5 = vld [vmem:[%s2888_s5 + $0x10] sm:$0xff]  ;;  %s2929_s24 = sld [smem:[#allocation11_spill]]  ;;  %vm140_vm1 = vcmask 261120   ;;  %v69_v30 = vlaneseq }
  0x1e   :  { %160 = vmatpush.msrb.mxu0 %v134_v5  ;;  %2001 = vmatpush.msra.mxu1 %v134_v5  ;;  %v133_v6 = vld [vmem:[%s2888_s5 + $0x8] sm:$0xff]  ;;  %v132_v7 = vld [vmem:[%s2888_s5] sm:$0xff]  ;;  %s2180_s28 = smov 96   ;;  %s2181_s12 = smov 64   ;;  %vm173_vm2 = vcmask 64512   ;;  %vm733_vm5 = vcmask 195584  }
  0x1f   :  { %v129_v10 = vld [vmem:[%s2887_s4] sm:$0xff]  ;;  %s2179_s4 = smov 88   ;;  %s2182_s29 = smov 120   ;;  %v2385_v31 = vand.u32 127, %v69_v30  ;;  %v2186_v35 = vmov -1e+09  }
  0x20   :  { %161 = vmatpush.msrb.mxu0 %v133_v6  ;;  %2002 = vmatpush.msra.mxu1 %v133_v6  ;;  %v2039_v16 = vld [vmem:[%s2889_s6] ss:$0 sm:$0xff]  ;;  %s2911_s0 = smov 80   ;;  %s2184_s30 = smov 112  }
  0x21   :  { %s2909_s20 = smov 104   ;;  %s2382_s21 = sld [smem:[#allocation3]] }
  0x22   :  { %162 = vmatpush.msrb.mxu0 %v132_v7  ;;  %2003 = vmatpush.msra.mxu1 %v132_v7  ;;  %s2913_s1 = smov 72   ;;  %s2404_s22 = sld [smem:[#allocation3 + $0x1]] }
  0x23   :  { %1901 = vmatmul.msk.f32.gmra.mxu0 %vm99_vm0, %v92_v4  ;;  %v2038_v8 = vld [vmem:[%s2929_s24] ss:$0 sm:$0xff]  ;;  %s2188_s2 = smov 56   ;;  %s2907_s23 = smov 40  }
  0x24   :  { %s2906_s24 = smov 48   ;;  %s2915_s25 = smov 8  }
  0x25   :  { %s2917_s3 = smov 16   ;;  %s2919_s26 = smov 24  }
  0x26   :  { %s2938_s27 = smov 24  }
  0x27   :  { %v72_v32 = vstv %s2382_s21 }
  0x28   :  { %vm75_vm3 = vcmp.lt.s32.totalorder %v2385_v31, %v72_v32  ;;  %v74_v54 = vstv %s2404_s22 }
  0x29   :  { %v2389_v36 = vsel %vm75_vm3, 0.0, %v2186_v35  ;;  %vm76_vm4 = vcmp.lt.s32.totalorder %v2385_v31, %v74_v54 }
  0x2a   :  { %v2408_v59 = vsel %vm76_vm4, 0.0, %v2186_v35 }
  0x98   :  { %v123_v9 = vpop.f32.mrf.mxu0 }
  0x99   :  { %v124_v11 = vadd.f32 %v2038_v8, %v123_v9 }
  0x9b   :  { %v2332_v12 = vadd.f32 %v129_v10, %v124_v11 }
  0x9d   :  { %1902 = vmatmul.msk.f32.vlgmr.msrb.gmra.mxu0 %vm140_vm1, %v2332_v12 }
  0xa0   :  { %v126_v13 = vpop.f32.mrf.mxu0 }
  0xa1   :  { %v127_v14 = vadd.f32 %v2038_v8, %v126_v13 }
  0xa3   :  { %v2336_v15 = vadd.f32 %v129_v10, %v127_v14 }
  0xa5   :  { %1903 = vmatmul.msk.f32.vlgmr.msra.gmra.mxu1 %vm140_vm1, %v2336_v15 }
 0x11a   :  { %v164_v17 = vpop.f32.mrf.mxu0 }
 0x11b   :  { %v2343_v18 = vadd.f32 %v2039_v16, %v164_v17 }
 0x11d   :  { %305 = vrot.lane.b32.xlu2 %v2343_v18, %s2179_s4  ;;  %171 = vrot.lane.b32.xlu0 %v2343_v18, %s2180_s28 }
 0x122   :  { %v167_v19 = vpop.f32.mrf.mxu1 }
 0x123   :  { %v2349_v20 = vadd.f32 %v2039_v16, %v167_v19 }
 0x125   :  { %199 = vrot.lane.b32.xlu1 %v2349_v20, %s2180_s28  ;;  %251 = vrot.lane.b32.xlu2 %v2343_v18, %s2181_s12 }
 0x12d   :  { %303 = vrot.lane.b32.xlu2 %v2343_v18, %s2182_s29 }
 0x135   :  { %333 = vrot.lane.b32.xlu2 %v2349_v20, %s2179_s4 }
 0x13d   :  { %439 = vrot.lane.b32.xlu2 %v2343_v18, %s2911_s0 }
 0x145   :  { %331 = vrot.lane.b32.xlu2 %v2349_v20, %s2182_s29 }
 0x14d   :  { %437 = vrot.lane.b32.xlu2 %v2343_v18, %s2184_s30 }
 0x155   :  { %465 = vrot.lane.b32.xlu2 %v2349_v20, %s2184_s30 }
 0x15d   :  { %571 = vrot.lane.b32.xlu2 %v2343_v18, %s2909_s20 }
 0x165   :  { %599 = vrot.lane.b32.xlu2 %v2349_v20, %s2909_s20 }
 0x177   :  { %v306_v21 = vpop.permute.xlu2 %305 }
 0x178   :  { %1910 = vmatpush.xpose.msk.msra.mxu0 %vm173_vm2, %v306_v21 }
 0x17f   :  { %v252_v22 = vpop.permute.xlu2 %251 }
 0x187   :  { %v304_v23 = vpop.permute.xlu2 %303 }
 0x188   :  { %1911 = vmatmul.msk.f32.vlgmr.msra.gmra.mxu0 %vm173_vm2, %v304_v23 }
 0x18f   :  { %v334_v24 = vpop.permute.xlu2 %333  ;;  %v172_v25 = vpop.permute.xlu0 %171 }
 0x190   :  { %1904 = vmatpush.xpose.msk.msra.mxu2 %vm173_vm2, %v172_v25 }
 0x193   :  { %1905 = vmatmul.msk.f32.vlgmr.msra.gmra.mxu2 %vm173_vm2, %v2343_v18 }
 0x194   :  { %272 = vmatpush.msrb.mxu2 %v252_v22 }
 0x196   :  { %1912 = vmatpush.xpose.msk.msra.mxu2 %vm173_vm2, %v334_v24 }
 0x197   :  { %v200_v26 = vpop.permute.xlu1 %199  ;;  %v440_v27 = vpop.permute.xlu2 %439 }
 0x198   :  { %1906 = vmatpush.xpose.msk.msra.mxu3 %vm173_vm2, %v200_v26  ;;  %1916 = vmatpush.xpose.msk.msrb.mxu0 %vm173_vm2, %v440_v27 }
 0x19b   :  { %1907 = vmatmul.msk.f32.vlgmr.msra.gmra.mxu3 %vm173_vm2, %v2349_v20 }
 0x19f   :  { %v332_v28 = vpop.permute.xlu2 %331 }
 0x1a7   :  { %v438_v29 = vpop.permute.xlu2 %437 }
 0x1a8   :  { %1917 = vmatmul.msk.f32.vlgmr.msrb.gmra.mxu0 %vm173_vm2, %v438_v29 }
 0x1af   :  { %v466_v4 = vpop.permute.xlu2 %465 }
 0x1b7   :  { %v572_v6 = vpop.permute.xlu2 %571 }
 0x1bf   :  { %v600_v7 = vpop.permute.xlu2 %599 }
 0x205   :  { %v328_v39 = vpop.f32.mrf.mxu0 }
 0x206   :  { %v359_v44 = vmul.f32 0.35355338, %v328_v39 }
 0x208   :  { %v361_v45 = vadd.f32 %v359_v44, %v2389_v36 }
 0x20a   :  { %v363_v46 = vsel %vm173_vm2, %v361_v45, -inf }
 0x216   :  { %v195_v33 = vpop.f32.mrf.mxu2 }
 0x217   :  { %v225_v34 = vmul.f32 0.35355338, %v195_v33 }
 0x219   :  { %v227_v37 = vadd.f32 %v225_v34, %v2389_v36 }
 0x21b   :  { %v229_v38 = vsel %vm173_vm2, %v227_v37, -inf }
 0x21c   :  { %230 = vmax.xlane.f32.xlu0 %v229_v38 }
 0x21e   :  { %v222_v55 = vpop.f32.mrf.mxu3 }
 0x21f   :  { %v226_v57 = vmul.f32 0.35355338, %v222_v55 }
 0x221   :  { %v228_v61 = vadd.f32 %v226_v57, %v2408_v59 }
 0x223   :  { %v232_v62 = vsel %vm173_vm2, %v228_v61, -inf }
 0x225   :  { %v462_v40 = vpop.f32.mrf.mxu0 }
 0x226   :  { %v493_v41 = vmul.f32 0.35355338, %v462_v40 }
 0x228   :  { %v495_v42 = vadd.f32 %v493_v41, %v2389_v36 }
 0x22a   :  { %v497_v43 = vsel %vm173_vm2, %v495_v42, -inf }
 0x22b   :  { %498 = vmax.xlane.f32.xlu2 %v497_v43  ;;  %v2023_v43 = vpack.i.bf16 %v2349_v20, %v2343_v18 }
 0x230   :  { %467 = vrot.lane.b32.xlu0 %v2349_v20, %s2911_s0 }
 0x238   :  { %601 = vrot.lane.b32.xlu0 %v2349_v20, %s2913_s1 }
 0x262   :  { %364 = vmax.xlane.f32.xlu0 %v363_v46 }
 0x28f   :  { %v231_v47 = vpop.xlane.xlu0 %230 }
 0x290   :  { %v235_v48 = vsub.f32 %v227_v37, %v231_v47 }
 0x292   :  { %v237_v49 = vmul.f32 1.442695, %v235_v48 }
 0x294   :  { %2056 = vpow2.f32 %v237_v49 }
 0x29a   :  { %v2057_v50 = vpop.eup %2056 }
 0x29b   :  { %v241_v51 = vsel %vm173_vm2, %v2057_v50, 0.0 }
 0x29c   :  { %242 = vadd.xlane.f32.xlu1 %v241_v51 }
 0x29e   :  { %v499_v11 = vpop.xlane.xlu2 %498 }
 0x29f   :  { %v503_v13 = vsub.f32 %v495_v42, %v499_v11 }
 0x2a1   :  { %v505_v19 = vmul.f32 1.442695, %v503_v13 }
 0x2a2   :  { %v468_v52 = vpop.permute.xlu0 %467 }
 0x2aa   :  { %v602_v53 = vpop.permute.xlu0 %601 }
 0x2b5   :  { %573 = vrot.lane.b32.xlu1 %v2343_v18, %s2913_s1 }
 0x2d5   :  { %v365_v56 = vpop.xlane.xlu0 %364 }
 0x2d6   :  { %v369_v58 = vsub.f32 %v361_v45, %v365_v56 }
 0x2d8   :  { %v371_v60 = vmul.f32 1.442695, %v369_v58 }
 0x2da   :  { %2058 = vpow2.f32 %v371_v60 }
 0x2df   :  { %233 = vmax.xlane.f32.xlu1 %v232_v62 }
 0x2e0   :  { %v2412_v63 = vpop.eup %2058 }
 0x2e1   :  { %v375_v0 = vsel %vm173_vm2, %v2412_v63, 0.0 }
 0x2e2   :  { %376 = vadd.xlane.f32.xlu2 %v375_v0 }
 0x2f8   :  { %277 = vrot.lane.b32.xlu1 %v2349_v20, %s2181_s12 }
 0x30f   :  { %v243_v1 = vpop.xlane.xlu1 %242 }
 0x310   :  { %2060 = vrcp.f32 %v243_v1 }
 0x311   :  { %2062 = vpow2.f32 %v505_v19 }
 0x316   :  { %v2061_v2 = vpop.eup %2060 }
 0x317   :  { %v249_v3 = vmul.f32 %v2061_v2, %v2057_v50  ;;  %v2434_v34 = vpop.eup %2062 }
 0x318   :  { %v509_v38 = vsel %vm173_vm2, %v2434_v34, 0.0 }
 0x319   :  { %1908 = vmatmul.msk.f32.vlgmr.msrb.gmra.mxu2 %vm173_vm2, %v249_v3 }
 0x31a   :  { %1918 = vmatpush.xpose.msk.msrb.mxu2 %vm173_vm2, %v468_v52 }
 0x321   :  { %1913 = vmatmul.msk.f32.vlgmr.msra.gmra.mxu2 %vm173_vm2, %v332_v28 }
 0x322   :  { %1924 = vmatpush.xpose.msk.msra.mxu2 %vm173_vm2, %v602_v53 }
 0x327   :  { %v574_v5 = vpop.permute.xlu1 %573 }
 0x328   :  { %1922 = vmatpush.xpose.msk.msra.mxu0 %vm173_vm2, %v574_v5 }
 0x329   :  { %1919 = vmatmul.msk.f32.vlgmr.msrb.gmra.mxu2 %vm173_vm2, %v466_v4 }
 0x32b   :  { %1923 = vmatmul.msk.f32.vlgmr.msra.gmra.mxu0 %vm173_vm2, %v572_v6 }
 0x331   :  { %1925 = vmatmul.msk.f32.vlgmr.msra.gmra.mxu2 %vm173_vm2, %v600_v7 }
 0x352   :  { %v234_v8 = vpop.xlane.xlu1 %233 }
 0x353   :  { %v236_v25 = vsub.f32 %v228_v61, %v234_v8 }
 0x355   :  { %v239_v32 = vmul.f32 1.442695, %v236_v25  ;;  %v377_v44 = vpop.xlane.xlu2 %376 }
 0x357   :  { %2064 = vpow2.f32 %v239_v32 }
 0x35d   :  { %v2065_v41 = vpop.eup %2064 }
 0x35e   :  { %v244_v42 = vsel %vm173_vm2, %v2065_v41, 0.0 }
 0x36a   :  { %v278_v9 = vpop.permute.xlu1 %277 }
 0x36b   :  { %298 = vmatpush.msrb.mxu3 %v278_v9 }
 0x39c   :  { %v2426_v10 = vpop.f32.mrf.mxu2 }
 0x3a4   :  { %v356_v14 = vpop.f32.mrf.mxu2 }
 0x3a5   :  { %v360_v16 = vmul.f32 0.35355338, %v356_v14 }
 0x3a7   :  { %v362_v17 = vadd.f32 %v360_v16, %v2408_v59 }
 0x3a8   :  { %v596_v21 = vpop.f32.mrf.mxu0 }
 0x3a9   :  { %v627_v22 = vmul.f32 0.35355338, %v596_v21  ;;  %v366_v23 = vsel %vm173_vm2, %v362_v17, -inf }
 0x3aa   :  { %367 = vmax.xlane.f32.xlu1 %v366_v23 }
 0x3ab   :  { %v629_v24 = vadd.f32 %v627_v22, %v2389_v36 }
 0x3ac   :  { %v490_v26 = vpop.f32.mrf.mxu2 }
 0x3ad   :  { %v494_v27 = vmul.f32 0.35355338, %v490_v26  ;;  %v631_v28 = vsel %vm173_vm2, %v629_v24, -inf }
 0x3ae   :  { %632 = vmax.xlane.f32.xlu0 %v631_v28 }
 0x3af   :  { %v496_v29 = vadd.f32 %v494_v27, %v2408_v59 }
 0x3b1   :  { %v500_v33 = vsel %vm173_vm2, %v496_v29, -inf }
 0x3b2   :  { %501 = vmax.xlane.f32.xlu2 %v500_v33 }
 0x3b4   :  { %v624_v35 = vpop.f32.mrf.mxu2 }
 0x3b5   :  { %v628_v37 = vmul.f32 0.35355338, %v624_v35 }
 0x3b6   :  { %510 = vadd.xlane.f32.xlu0 %v509_v38 }
 0x3b7   :  { %v630_v39 = vadd.f32 %v628_v37, %v2408_v59 }
 0x3b9   :  { %v634_v40 = vsel %vm173_vm2, %v630_v39, -inf }
 0x3ba   :  { %635 = vmax.xlane.f32.xlu1 %v634_v40 }
 0x3be   :  { %245 = vadd.xlane.f32.xlu0 %v244_v42  ;;  %v739_v42 = vld [vmem:[%s2890_s7 + $0x18] sm:$0xff] }
 0x3bf   :  { %762 = vmatpush.msrb.mxu0 %v739_v42 }
 0x3ca   :  { %2024 = vrot.lane.b32.xlu2 %v2023_v43, %s2188_s2  ;;  %v738_v43 = vld [vmem:[%s2890_s7 + $0x10] sm:$0xff] }
 0x3cb   :  { %763 = vmatpush.msrb.mxu0 %v738_v43 }
 0x3d2   :  { %653 = vrot.lane.b32.xlu2 %v2343_v18, %s2907_s23 }
 0x3d3   :  { %519 = vrot.lane.b32.xlu1 %v2343_v18, %s2906_s24 }
 0x3da   :  { %679 = vrot.lane.b32.xlu2 %v2349_v20, %s2907_s23 }
 0x41d   :  { %v368_v45 = vpop.xlane.xlu1 %367 }
 0x41e   :  { %v370_v48 = vsub.f32 %v362_v17, %v368_v45  ;;  %v736_v45 = vld [vmem:[%s2890_s7] sm:$0xff] }
 0x420   :  { %v373_v51 = vmul.f32 1.442695, %v370_v48 }
 0x421   :  { %v633_v46 = vpop.xlane.xlu0 %632 }
 0x422   :  { %v637_v47 = vsub.f32 %v629_v24, %v633_v46 }
 0x424   :  { %v639_v49 = vmul.f32 1.442695, %v637_v47 }
 0x425   :  { %v502_v50 = vpop.xlane.xlu2 %501 }
 0x426   :  { %2066 = vpow2.f32 %v639_v49  ;;  %v504_v54 = vsub.f32 %v496_v29, %v502_v50 }
 0x427   :  { %2068 = vpow2.f32 %v373_v51 }
 0x428   :  { %v507_v61 = vmul.f32 1.442695, %v504_v54 }
 0x429   :  { %v511_v52 = vpop.xlane.xlu0 %510 }
 0x42c   :  { %v2067_v53 = vpop.eup %2066 }
 0x42d   :  { %v636_v55 = vpop.xlane.xlu1 %635  ;;  %v2025_v56 = vpop.permute.xlu2 %2024  ;;  %v643_v18 = vsel %vm173_vm2, %v2067_v53, 0.0 }
 0x42e   :  { %v638_v57 = vsub.f32 %v630_v39, %v636_v55  ;;  %v2026_v58 = vunpack.i.l.bf16 %v2025_v56  ;;  %644 = vadd.xlane.f32.xlu0 %v643_v18  ;;  %v2027_v60 = vunpack.i.h.bf16 %v2025_v56  ;;  %v2069_v1 = vpop.eup %2068 }
 0x42f   :  { %v378_v2 = vsel %vm173_vm2, %v2069_v1, 0.0 }
 0x430   :  { %v641_v62 = vmul.f32 1.442695, %v638_v57  ;;  %406 = vmatpush.msra.mxu3 %v2026_v58  ;;  %432 = vmatpush.msrb.mxu1 %v2027_v60 }
 0x431   :  { %v246_v0 = vpop.xlane.xlu0 %245 }
 0x432   :  { %2070 = vpow2.f32 %v641_v62 }
 0x433   :  { %2072 = vrcp.f32 %v246_v0 }
 0x434   :  { %2074 = vpow2.f32 %v507_v61 }
 0x435   :  { %2076 = vrcp.f32 %v377_v44  ;;  %v654_v14 = vpop.permute.xlu2 %653  ;;  %v737_v44 = vld [vmem:[%s2890_s7 + $0x8] sm:$0xff] }
 0x436   :  { %379 = vadd.xlane.f32.xlu0 %v378_v2  ;;  %2078 = vrcp.f32 %v511_v52  ;;  %764 = vmatpush.msrb.mxu0 %v737_v44 }
 0x438   :  { %v2071_v3 = vpop.eup %2070  ;;  %765 = vmatpush.msrb.mxu0 %v736_v45  ;;  %v2042_v45 = vld [vmem:[%s2893_s10] ss:$0 sm:$0xff] }
 0x439   :  { %v2073_v4 = vpop.eup %2072  ;;  %v646_v5 = vsel %vm173_vm2, %v2071_v3, 0.0 }
 0x43a   :  { %v2075_v6 = vpop.eup %2074  ;;  %647 = vadd.xlane.f32.xlu1 %v646_v5  ;;  %v250_v7 = vmul.f32 %v2073_v4, %v2065_v41 }
 0x43b   :  { %v512_v8 = vsel %vm173_vm2, %v2075_v6, 0.0  ;;  %v2077_v9 = vpop.eup %2076 }
 0x43c   :  { %1909 = vmatmul.msk.f32.vlgmr.msrb.gmra.mxu3 %vm173_vm2, %v250_v7  ;;  %v383_v11 = vmul.f32 %v2077_v9, %v2412_v63  ;;  %v2079_v16 = vpop.eup %2078 }
 0x43d   :  { %v517_v17 = vmul.f32 %v2079_v16, %v2434_v34  ;;  %v680_v32 = vpop.permute.xlu2 %679 }
 0x43e   :  { %513 = vadd.xlane.f32.xlu0 %v512_v8 }
 0x444   :  { %1914 = vmatmul.msk.f32.vlgmr.msra.gmra.mxu3 %vm173_vm2, %v383_v11 }
 0x445   :  { %v520_v13 = vpop.permute.xlu1 %519 }
 0x446   :  { %540 = vmatpush.msrb.mxu3 %v520_v13 }
 0x448   :  { %674 = vmatpush.msra.mxu3 %v654_v14 }
 0x44c   :  { %1920 = vmatmul.msk.f32.vlgmr.msrb.gmra.mxu3 %vm173_vm2, %v517_v17 }
 0x452   :  { %545 = vrot.lane.b32.xlu0 %v2349_v20, %s2906_s24 }
 0x4a1   :  { %v645_v19 = vpop.xlane.xlu0 %644 }
 0x4a2   :  { %2080 = vrcp.f32 %v645_v19 }
 0x4a8   :  { %v2081_v21 = vpop.eup %2080 }
 0x4a9   :  { %v651_v22 = vmul.f32 %v2081_v21, %v2067_v53  ;;  %v380_v23 = vpop.xlane.xlu0 %379 }
 0x4aa   :  { %2082 = vrcp.f32 %v380_v23  ;;  %v841_v23 = vld [vmem:[%s2894_s11 + $0x18] sm:$0xff] }
 0x4ab   :  { %1926 = vmatmul.msk.f32.vlgmr.msra.gmra.mxu3 %vm173_vm2, %v651_v22 }
 0x4ad   :  { %v648_v27 = vpop.xlane.xlu1 %647 }
 0x4b0   :  { %v2083_v63 = vpop.eup %2082 }
 0x4b1   :  { %v384_v24 = vmul.f32 %v2083_v63, %v2069_v1  ;;  %v514_v25 = vpop.xlane.xlu0 %513  ;;  %v840_v63 = vld [vmem:[%s2894_s11 + $0x10] sm:$0xff] }
 0x4b2   :  { %2084 = vrcp.f32 %v514_v25  ;;  %v838_v25 = vld [vmem:[%s2894_s11] sm:$0xff] }
 0x4b3   :  { %1915 = vmatmul.msk.f32.vlgmr.msrb.gmra.mxu1 %vm173_vm2, %v384_v24  ;;  %2086 = vrcp.f32 %v648_v27  ;;  %v839_v24 = vld [vmem:[%s2894_s11 + $0x8] sm:$0xff] }
 0x4b8   :  { %v2085_v28 = vpop.eup %2084 }
 0x4b9   :  { %v518_v29 = vmul.f32 %v2085_v28, %v2075_v6  ;;  %v2087_v34 = vpop.eup %2086 }
 0x4ba   :  { %v652_v35 = vmul.f32 %v2087_v34, %v2071_v3  ;;  %v2194_v3 = vmov 32.0  }
 0x4bb   :  { %2088 = vrcp.f32 %v2194_v3 }
 0x4bf   :  { %v300_v26 = vpop.f32.mrf.mxu3 }
 0x4c1   :  { %v2089_v4 = vpop.eup %2088 }
 0x4c2   :  { %v784_v5 = vmul.f32 32.0, %v2089_v4  ;;  %vm788_vm6 = vweird.f32 %v2089_v4 }
 0x4c4   :  { %v546_v20 = vpop.permute.xlu0 %545  ;;  %v785_v6 = vsub.f32 1.0, %v784_v5  ;;  %v879_v5 = vld [vmem:[%s2896_s13 + $0x10] sm:$0xff] }
 0x4c5   :  { %566 = vmatpush.msra.mxu1 %v546_v20 }
 0x4c6   :  { %1921 = vmatmul.msk.f32.vlgmr.msra.gmra.mxu1 %vm173_vm2, %v518_v29  ;;  %v786_v7 = vmul.f32 %v2089_v4, %v785_v6  ;;  %v878_v6 = vld [vmem:[%s2896_s13 + $0x8] sm:$0xff] }
 0x4c7   :  { %v408_v33 = vpop.f32.mrf.mxu3  ;;  %700 = vmatpush.msrb.mxu1 %v680_v32 }
 0x4c8   :  { %707 = vrot.lane.b32.xlu2 %v408_v33, %s2915_s25  ;;  %v787_v8 = vadd.f32 %v2089_v4, %v786_v7  ;;  %v877_v7 = vld [vmem:[%s2896_s13] sm:$0xff] }
 0x4c9   :  { %864 = vmatpush.msra.mxu1 %v841_v23 }
 0x4ca   :  { %v2499_v9 = vsel %vm788_vm6, %v2089_v4, %v787_v8 }
 0x4cb   :  { %865 = vmatpush.msra.mxu1 %v840_v63 }
 0x4cd   :  { %866 = vmatpush.msra.mxu1 %v839_v24 }
 0x4ce   :  { %1927 = vmatmul.msk.f32.vlgmr.msrb.gmra.mxu1 %vm173_vm2, %v652_v35  ;;  %v892_v35 = vld [vmem:[%s2896_s13 + $0x78] sm:$0xff] }
 0x4cf   :  { %v542_v37 = vpop.f32.mrf.mxu3  ;;  %867 = vmatpush.msra.mxu1 %v838_v25  ;;  %897 = vmatpush.msrb.mxu3 %v892_v35 }
 0x4d0   :  { %715 = vrot.lane.b32.xlu2 %v542_v37, %s2917_s3  ;;  %v891_v37 = vld [vmem:[%s2896_s13 + $0x70] sm:$0xff] }
 0x4d1   :  { %898 = vmatpush.msrb.mxu3 %v891_v37 }
 0x522   :  { %v708_v46 = vpop.permute.xlu2 %707 }
 0x523   :  { %v729_v48 = vsel %vm173_vm2, %v2426_v10, %v708_v46  ;;  %v2040_v10 = vld [vmem:[%s2891_s8] ss:$0 sm:$0xff] }
 0x524   :  { %v889_v46 = vld [vmem:[%s2896_s13 + $0x60] sm:$0xff] }
 0x52a   :  { %v716_v47 = vpop.permute.xlu2 %715 }
 0x52b   :  { %v731_v49 = vsel %vm99_vm0, %v729_v48, %v716_v47 }
 0x52e   :  { %v676_v38 = vpop.f32.mrf.mxu3 }
 0x52f   :  { %723 = vrot.lane.b32.xlu0 %v676_v38, %s2919_s26 }
 0x530   :  { %v434_v39 = vpop.f32.mrf.mxu1 }
 0x531   :  { %709 = vrot.lane.b32.xlu2 %v434_v39, %s2915_s25  ;;  %v2041_v39 = vld [vmem:[%s2892_s9] ss:$0 sm:$0xff] }
 0x543   :  { %v568_v40 = vpop.f32.mrf.mxu1 }
 0x544   :  { %717 = vrot.lane.b32.xlu0 %v568_v40, %s2917_s3  ;;  %v890_v40 = vld [vmem:[%s2896_s13 + $0x68] sm:$0xff]  ;;  %s2196_s3 = smov [#allocation4]  }
 0x545   :  { %899 = vmatpush.msrb.mxu3 %v890_v40  ;;  %v1934_v40 = vld [vmem:[%s2888_s5 + $0x30] sm:$0xff] }
 0x547   :  { %900 = vmatpush.msrb.mxu3 %v889_v46 }
 0x54b   :  { %v702_v41 = vpop.f32.mrf.mxu1 }
 0x54c   :  { %725 = vrot.lane.b32.xlu2 %v702_v41, %s2919_s26  ;;  %s2930_s26 = sld [smem:[#allocation12_spill]] }
 0x552   :  { %v2043_v8 = vld [vmem:[%s2930_s26] ss:$0 sm:$0xff] }
 0x58b   :  { %v710_v52 = vpop.permute.xlu2 %709 }
 0x58c   :  { %v730_v53 = vsel %vm173_vm2, %v300_v26, %v710_v52  ;;  %v886_v52 = vld [vmem:[%s2896_s13 + $0x48] sm:$0xff] }
 0x5a1   :  { %v724_v50 = vpop.permute.xlu0 %723 }
 0x5a2   :  { %v734_v51 = vsel %vm733_vm5, %v731_v49, %v724_v50  ;;  %v888_v49 = vld [vmem:[%s2896_s13 + $0x58] sm:$0xff] }
 0x5a3   :  { %1928 = vmatmul.msk.f32.vlgmr.msrb.gmra.mxu0 %vm140_vm1, %v734_v51  ;;  %v887_v51 = vld [vmem:[%s2896_s13 + $0x50] sm:$0xff]  ;;  %901 = vmatpush.msrb.mxu3 %v888_v49 }
 0x5a5   :  { %902 = vmatpush.msrb.mxu3 %v887_v51 }
 0x5a6   :  { %v726_v55 = vpop.permute.xlu2 %725 }
 0x5a7   :  { %903 = vmatpush.msrb.mxu3 %v886_v52  ;;  %v2045_v52 = vld [vmem:[%s2898_s15] ss:$0 sm:$0xff] }
 0x5b6   :  { %v718_v54 = vpop.permute.xlu0 %717 }
 0x5b7   :  { %v732_v56 = vsel %vm99_vm0, %v730_v53, %v718_v54  ;;  %v885_v53 = vld [vmem:[%s2896_s13 + $0x40] sm:$0xff] }
 0x5b8   :  { %v735_v18 = vsel %vm733_vm5, %v732_v56, %v726_v55  ;;  %v884_v55 = vld [vmem:[%s2896_s13 + $0x38] sm:$0xff]  ;;  %904 = vmatpush.msrb.mxu3 %v885_v53 }
 0x5b9   :  { %1929 = vmatmul.msk.f32.gmra.mxu0 %vm140_vm1, %v735_v18  ;;  %v883_v18 = vld [vmem:[%s2896_s13 + $0x30] sm:$0xff] }
 0x5ba   :  { %905 = vmatpush.msrb.mxu3 %v884_v55 }
 0x5bc   :  { %906 = vmatpush.msrb.mxu3 %v883_v18  ;;  %v2046_v18 = vld [vmem:[%s2899_s16] ss:$0 sm:$0xff] }
 0x620   :  { %v767_v57 = vpop.f32.mrf.mxu0 }
 0x621   :  { %v768_v58 = vadd.f32 %v2040_v10, %v767_v57  ;;  %v882_v57 = vld [vmem:[%s2896_s13 + $0x28] sm:$0xff] }
 0x622   :  { %907 = vmatpush.msrb.mxu3 %v882_v57 }
 0x623   :  { %v773_v60 = vadd.f32 %v768_v58, %v2332_v12 }
 0x625   :  { %v777_v61 = vsel %vm140_vm1, %v773_v60, 0.0 }
 0x626   :  { %778 = vadd.xlane.f32.xlu0 %v777_v61 }
 0x636   :  { %v770_v62 = vpop.f32.mrf.mxu0 }
 0x637   :  { %v771_v0 = vadd.f32 %v2040_v10, %v770_v62  ;;  %v880_v62 = vld [vmem:[%s2896_s13 + $0x18] sm:$0xff] }
 0x639   :  { %v774_v1 = vadd.f32 %v771_v0, %v2336_v15 }
 0x63b   :  { %v780_v2 = vsel %vm140_vm1, %v774_v1, 0.0 }
 0x63c   :  { %781 = vadd.xlane.f32.xlu1 %v780_v2 }
 0x699   :  { %v779_v12 = vpop.xlane.xlu0 %778 }
 0x69a   :  { %v790_v11 = vmul.f32 %v2499_v9, %v779_v12 }
 0x69c   :  { %v792_v13 = vsub.f32 %v773_v60, %v790_v11  ;;  %v881_v60 = vld [vmem:[%s2896_s13 + $0x20] sm:$0xff] }
 0x69d   :  { %908 = vmatpush.msrb.mxu3 %v881_v60 }
 0x69e   :  { %v794_v14 = vmul.f32 %v792_v13, %v792_v13 }
 0x69f   :  { %909 = vmatpush.msrb.mxu3 %v880_v62 }
 0x6a0   :  { %v796_v15 = vsel %vm140_vm1, %v794_v14, 0.0 }
 0x6a1   :  { %797 = vadd.xlane.f32.xlu2 %v796_v15  ;;  %910 = vmatpush.msrb.mxu3 %v879_v5 }
 0x6a3   :  { %911 = vmatpush.msrb.mxu3 %v878_v6 }
 0x6a5   :  { %912 = vmatpush.msrb.mxu3 %v877_v7  ;;  %v2047_v7 = vld [vmem:[%s2889_s6 + $0x1] ss:$0 sm:$0xff]  ;;  %s2931_s6 = smov 72  }
 0x6af   :  { %v782_v16 = vpop.xlane.xlu1 %781 }
 0x6b0   :  { %v791_v17 = vmul.f32 %v2499_v9, %v782_v16 }
 0x6b2   :  { %v2504_v19 = vsub.f32 %v774_v1, %v791_v17  ;;  %v2044_v17 = vld [vmem:[%s2897_s14] ss:$0 sm:$0xff] }
 0x6b4   :  { %v795_v21 = vmul.f32 %v2504_v19, %v2504_v19 }
 0x6b6   :  { %v799_v22 = vsel %vm140_vm1, %v795_v21, 0.0 }
 0x6b7   :  { %800 = vadd.xlane.f32.xlu1 %v799_v22 }
 0x714   :  { %v798_v26 = vpop.xlane.xlu2 %797 }
 0x715   :  { %v802_v27 = vmul.f32 %v798_v26, %v2499_v9 }
 0x717   :  { %v804_v28 = vadd.f32 1e-05, %v802_v27 }
 0x719   :  { %2090 = vrsqrt.f32 %v804_v28  ;;  %vm812_vm8 = vweird.f32 %v804_v28 }
 0x71f   :  { %v2091_v29 = vpop.eup %2090 }
 0x720   :  { %v807_v20 = vmul.f32 %v2091_v29, %v804_v28  ;;  %vm813_vm7 = vweird.f32 %v2091_v29 }
 0x721   :  { %vm814_vm9 = vmor %vm812_vm8, %vm813_vm7 }
 0x722   :  { %v808_v32 = vmul.f32 %v2091_v29, %v807_v20 }
 0x724   :  { %v809_v33 = vmul.f32 0.5, %v808_v32 }
 0x726   :  { %v810_v34 = vsub.f32 1.5, %v809_v33 }
 0x728   :  { %v811_v38 = vmul.f32 %v2091_v29, %v810_v34 }
 0x72a   :  { %v815_v41 = vsel %vm814_vm9, %v2091_v29, %v811_v38  ;;  %v801_v42 = vpop.xlane.xlu1 %800 }
 0x72b   :  { %v826_v43 = vmul.f32 %v815_v41, %v792_v13  ;;  %v803_v44 = vmul.f32 %v801_v42, %v2499_v9  ;;  %v1933_v41 = vld [vmem:[%s2888_s5 + $0x28] sm:$0xff]  ;;  %v1932_v42 = vld [vmem:[%s2888_s5 + $0x20] sm:$0xff] }
 0x72d   :  { %v831_v47 = vmul.f32 %v2041_v39, %v826_v43  ;;  %v805_v48 = vadd.f32 1e-05, %v803_v44 }
 0x72f   :  { %2092 = vrsqrt.f32 %v805_v48  ;;  %v836_v50 = vadd.f32 %v2042_v45, %v831_v47  ;;  %vm822_vm11 = vweird.f32 %v805_v48 }
 0x731   :  { %1930 = vmatmul.msk.f32.vlgmr.msra.gmra.mxu1 %vm140_vm1, %v836_v50 }
 0x735   :  { %v2093_v54 = vpop.eup %2092 }
 0x736   :  { %v817_v56 = vmul.f32 %v2093_v54, %v805_v48  ;;  %vm823_vm10 = vweird.f32 %v2093_v54 }
 0x737   :  { %vm824_vm12 = vmor %vm822_vm11, %vm823_vm10 }
 0x738   :  { %v818_v10 = vmul.f32 %v2093_v54, %v817_v56 }
 0x73a   :  { %v819_v58 = vmul.f32 0.5, %v818_v10 }
 0x73c   :  { %v820_v61 = vsub.f32 1.5, %v819_v58 }
 0x73e   :  { %v821_v0 = vmul.f32 %v2093_v54, %v820_v61 }
 0x740   :  { %v825_v1 = vsel %vm824_vm12, %v2093_v54, %v821_v0 }
 0x741   :  { %v827_v2 = vmul.f32 %v825_v1, %v2504_v19 }
 0x743   :  { %v832_v3 = vmul.f32 %v2041_v39, %v827_v2  ;;  %v1935_v39 = vld [vmem:[%s2888_s5 + $0x38] sm:$0xff] }
 0x744   :  { %1006 = vmatpush.msrb.mxu1 %v1935_v39 }
 0x745   :  { %v837_v4 = vadd.f32 %v2042_v45, %v832_v3 }
 0x746   :  { %1007 = vmatpush.msrb.mxu1 %v1934_v40 }
 0x747   :  { %1931 = vmatmul.msk.f32.gmra.mxu1 %vm140_vm1, %v837_v4 }
 0x748   :  { %1008 = vmatpush.msrb.mxu1 %v1933_v41 }
 0x74a   :  { %1009 = vmatpush.msrb.mxu1 %v1932_v42 }
 0x7ae   :  { %v869_v12 = vpop.f32.mrf.mxu1 }
 0x7af   :  { %v870_v11 = vadd.f32 %v2043_v8, %v869_v12 }
 0x7b1   :  { %v875_v13 = vmax.f32 %v870_v11, 0.0 }
 0x7b3   :  { %913 = vmatmul.f32.vlgmr.msrb.gmra.mxu3 %v875_v13 }
 0x7c4   :  { %v872_v14 = vpop.f32.mrf.mxu1 }
 0x7c5   :  { %v873_v15 = vadd.f32 %v2043_v8, %v872_v14 }
 0x7c7   :  { %v876_v16 = vmax.f32 %v873_v15, 0.0 }
 0x7c9   :  { %916 = vmatmul.f32.gmra.mxu3 %v876_v16 }
 0x836   :  { %v914_v19 = vpop.f32.mrf.mxu3 }
 0x837   :  { %v915_v21 = vadd.f32 %v2044_v17, %v914_v19 }
 0x839   :  { %v920_v22 = vadd.f32 %v915_v21, %v836_v50 }
 0x83b   :  { %v924_v23 = vsel %vm140_vm1, %v920_v22, 0.0 }
 0x83c   :  { %925 = vadd.xlane.f32.xlu1 %v924_v23 }
 0x84c   :  { %v917_v63 = vpop.f32.mrf.mxu3 }
 0x84d   :  { %v918_v24 = vadd.f32 %v2044_v17, %v917_v63 }
 0x84f   :  { %v921_v25 = vadd.f32 %v918_v24, %v837_v4 }
 0x851   :  { %v927_v26 = vsel %vm140_vm1, %v921_v25, 0.0 }
 0x852   :  { %928 = vadd.xlane.f32.xlu1 %v927_v26 }
 0x8af   :  { %v926_v27 = vpop.xlane.xlu1 %925 }
 0x8b0   :  { %v930_v28 = vmul.f32 %v926_v27, %v2499_v9 }
 0x8b2   :  { %v932_v29 = vsub.f32 %v920_v22, %v930_v28 }
 0x8b4   :  { %v934_v20 = vmul.f32 %v932_v29, %v932_v29 }
 0x8b6   :  { %v936_v32 = vsel %vm140_vm1, %v934_v20, 0.0 }
 0x8b7   :  { %937 = vadd.xlane.f32.xlu1 %v936_v32 }
 0x8c5   :  { %v929_v33 = vpop.xlane.xlu1 %928 }
 0x8c6   :  { %v931_v34 = vmul.f32 %v929_v33, %v2499_v9 }
 0x8c8   :  { %v933_v35 = vsub.f32 %v921_v25, %v931_v34 }
 0x8ca   :  { %v935_v37 = vmul.f32 %v933_v35, %v933_v35 }
 0x8cc   :  { %v939_v38 = vsel %vm140_vm1, %v935_v37, 0.0 }
 0x8cd   :  { %940 = vadd.xlane.f32.xlu0 %v939_v38 }
 0x92a   :  { %v938_v43 = vpop.xlane.xlu1 %937 }
 0x92b   :  { %v942_v44 = vmul.f32 %v938_v43, %v2499_v9 }
 0x92d   :  { %v944_v45 = vadd.f32 1e-05, %v942_v44 }
 0x92f   :  { %2094 = vrsqrt.f32 %v944_v45  ;;  %vm952_vm14 = vweird.f32 %v944_v45 }
 0x935   :  { %v2095_v46 = vpop.eup %2094 }
 0x936   :  { %v947_v47 = vmul.f32 %v2095_v46, %v944_v45  ;;  %vm953_vm13 = vweird.f32 %v2095_v46 }
 0x937   :  { %vm954_vm15 = vmor %vm952_vm14, %vm953_vm13 }
 0x938   :  { %v948_v48 = vmul.f32 %v2095_v46, %v947_v47 }
 0x93a   :  { %v949_v49 = vmul.f32 0.5, %v948_v48 }
 0x93c   :  { %v950_v50 = vsub.f32 1.5, %v949_v49 }
 0x93e   :  { %v951_v51 = vmul.f32 %v2095_v46, %v950_v50 }
 0x940   :  { %v955_v53 = vsel %vm954_vm15, %v2095_v46, %v951_v51  ;;  %v941_v54 = vpop.xlane.xlu0 %940 }
 0x941   :  { %v966_v55 = vmul.f32 %v955_v53, %v932_v29  ;;  %v943_v56 = vmul.f32 %v941_v54, %v2499_v9 }
 0x943   :  { %v971_v10 = vmul.f32 %v2045_v52, %v966_v55  ;;  %v945_v57 = vadd.f32 1e-05, %v943_v56 }
 0x945   :  { %2096 = vrsqrt.f32 %v945_v57  ;;  %v2612_v58 = vadd.f32 %v2046_v18, %v971_v10  ;;  %vm962_vm4 = vweird.f32 %v945_v57 }
 0x947   :  { %1937 = vmatmul.msk.f32.vlgmr.msrb.gmra.mxu1 %vm140_vm1, %v2612_v58 }
 0x94b   :  { %v2097_v60 = vpop.eup %2096 }
 0x94c   :  { %v957_v61 = vmul.f32 %v2097_v60, %v945_v57  ;;  %vm963_vm3 = vweird.f32 %v2097_v60 }
 0x94d   :  { %vm964_vm6 = vmor %vm962_vm4, %vm963_vm3 }
 0x94e   :  { %v958_v62 = vmul.f32 %v2097_v60, %v957_v61 }
 0x950   :  { %v959_v0 = vmul.f32 0.5, %v958_v62 }
 0x952   :  { %v960_v1 = vsub.f32 1.5, %v959_v0 }
 0x954   :  { %v961_v2 = vmul.f32 %v2097_v60, %v960_v1 }
 0x956   :  { %v965_v3 = vsel %vm964_vm6, %v2097_v60, %v961_v2 }
 0x957   :  { %v967_v4 = vmul.f32 %v965_v3, %v933_v35 }
 0x959   :  { %v972_v5 = vmul.f32 %v2045_v52, %v967_v4 }
 0x95b   :  { %v2616_v6 = vadd.f32 %v2046_v18, %v972_v5 }
 0x95d   :  { %1938 = vmatmul.msk.f32.gmra.mxu1 %vm140_vm1, %v2616_v6 }
 0x9c4   :  { %v1011_v8 = vpop.f32.mrf.mxu1 }
 0x9c5   :  { %v2623_v12 = vadd.f32 %v2047_v7, %v1011_v8 }
 0x9c7   :  { %1151 = vrot.lane.b32.xlu0 %v2623_v12, %s2179_s4  ;;  %1018 = vrot.lane.b32.xlu1 %v2623_v12, %s2180_s28 }
 0x9cf   :  { %1149 = vrot.lane.b32.xlu1 %v2623_v12, %s2182_s29 }
 0x9da   :  { %v1014_v11 = vpop.f32.mrf.mxu1 }
 0x9db   :  { %v2631_v13 = vadd.f32 %v2047_v7, %v1014_v11 }
 0x9dd   :  { %1045 = vrot.lane.b32.xlu2 %v2631_v13, %s2180_s28  ;;  %v2655_v32 = vpack.i.bf16 %v2631_v13, %v2623_v12  ;;  %s2932_s28 = smov 80  }
 0xa37   :  { %v1046_v14 = vpop.permute.xlu2 %1045 }
 0xa38   :  { %1941 = vmatpush.xpose.msk.msrb.mxu2 %vm173_vm2, %v1046_v14 }
 0xa39   :  { %v1152_v15 = vpop.permute.xlu0 %1151  ;;  %v1019_v16 = vpop.permute.xlu1 %1018 }
 0xa3a   :  { %1939 = vmatpush.xpose.msk.msra.mxu0 %vm173_vm2, %v1019_v16 }
 0xa3b   :  { %1942 = vmatmul.msk.f32.vlgmr.msrb.gmra.mxu2 %vm173_vm2, %v2631_v13 }
 0xa3c   :  { %1945 = vmatpush.xpose.msk.msra.mxu2 %vm173_vm2, %v1152_v15 }
 0xa3d   :  { %1940 = vmatmul.msk.f32.vlgmr.msra.gmra.mxu0 %vm173_vm2, %v2623_v12 }
 0xa41   :  { %v1150_v17 = vpop.permute.xlu1 %1149 }
 0xa43   :  { %1946 = vmatmul.msk.f32.vlgmr.msra.gmra.mxu2 %vm173_vm2, %v1150_v17 }
 0xaba   :  { %v1041_v19 = vpop.f32.mrf.mxu0 }
 0xabb   :  { %v1071_v21 = vmul.f32 0.35355338, %v1041_v19 }
 0xabd   :  { %v1073_v22 = vadd.f32 %v1071_v21, %v2389_v36 }
 0xabe   :  { %v1068_v23 = vpop.f32.mrf.mxu2 }
 0xabf   :  { %v1072_v63 = vmul.f32 0.35355338, %v1068_v23  ;;  %v1075_v24 = vsel %vm173_vm2, %v1073_v22, -inf }
 0xac0   :  { %1076 = vmax.xlane.f32.xlu0 %v1075_v24 }
 0xac1   :  { %v1074_v25 = vadd.f32 %v1072_v63, %v2408_v59 }
 0xac3   :  { %v1078_v26 = vsel %vm173_vm2, %v1074_v25, -inf }
 0xac4   :  { %1079 = vmax.xlane.f32.xlu2 %v1078_v26 }
 0xac6   :  { %v1174_v27 = vpop.f32.mrf.mxu2 }
 0xac7   :  { %v1205_v28 = vmul.f32 0.35355338, %v1174_v27 }
 0xac9   :  { %v1207_v29 = vadd.f32 %v1205_v28, %v2389_v36 }
 0xacb   :  { %v1209_v20 = vsel %vm173_vm2, %v1207_v29, -inf }
 0xacc   :  { %1210 = vmax.xlane.f32.xlu1 %v1209_v20 }
 0xad4   :  { %1177 = vrot.lane.b32.xlu0 %v2631_v13, %s2182_s29  ;;  %s2935_s29 = smov 48  }
 0xadc   :  { %1283 = vrot.lane.b32.xlu0 %v2623_v12, %s2184_s30 }
 0xae4   :  { %1311 = vrot.lane.b32.xlu0 %v2631_v13, %s2184_s30  ;;  %s2936_s30 = smov 8  }
 0xae5   :  { %2029 = vrot.lane.b32.xlu1 %v2655_v32, %s2181_s12  ;;  %s2933_s12 = smov 104  }
 0xaed   :  { %1231 = vrot.lane.b32.xlu1 %v2623_v12, %s2188_s2 }
 0xaf5   :  { %1419 = vrot.lane.b32.xlu1 %v2623_v12, %s2931_s6 }
 0xafd   :  { %1447 = vrot.lane.b32.xlu1 %v2631_v13, %s2931_s6 }
 0xb33   :  { %v1077_v33 = vpop.xlane.xlu0 %1076 }
 0xb34   :  { %v1081_v34 = vsub.f32 %v1073_v22, %v1077_v33 }
 0xb36   :  { %v1083_v35 = vmul.f32 1.442695, %v1081_v34 }
 0xb37   :  { %v1080_v37 = vpop.xlane.xlu2 %1079 }
 0xb38   :  { %2098 = vpow2.f32 %v1083_v35  ;;  %v1082_v38 = vsub.f32 %v1074_v25, %v1080_v37 }
 0xb3a   :  { %v1085_v39 = vmul.f32 1.442695, %v1082_v38 }
 0xb3c   :  { %2100 = vpow2.f32 %v1085_v39 }
 0xb3e   :  { %v2099_v40 = vpop.eup %2098 }
 0xb3f   :  { %v1211_v41 = vpop.xlane.xlu1 %1210  ;;  %v1087_v42 = vsel %vm173_vm2, %v2099_v40, 0.0 }
 0xb40   :  { %v1215_v43 = vsub.f32 %v1207_v29, %v1211_v41  ;;  %1088 = vadd.xlane.f32.xlu2 %v1087_v42 }
 0xb42   :  { %v2101_v44 = vpop.eup %2100  ;;  %v1217_v45 = vmul.f32 1.442695, %v1215_v43 }
 0xb43   :  { %v1090_v46 = vsel %vm173_vm2, %v2101_v44, 0.0 }
 0xb44   :  { %2102 = vpow2.f32 %v1217_v45  ;;  %1091 = vadd.xlane.f32.xlu0 %v1090_v46 }
 0xb46   :  { %v1178_v53 = vpop.permute.xlu0 %1177 }
 0xb4a   :  { %v2103_v47 = vpop.eup %2102 }
 0xb4b   :  { %v1221_v48 = vsel %vm173_vm2, %v2103_v47, 0.0 }
 0xb4c   :  { %1222 = vadd.xlane.f32.xlu0 %v1221_v48 }
 0xb4e   :  { %v1284_v54 = vpop.permute.xlu0 %1283 }
 0xb56   :  { %v1312_v55 = vpop.permute.xlu0 %1311 }
 0xb57   :  { %v2030_v49 = vpop.permute.xlu1 %2029 }
 0xb58   :  { %v2032_v50 = vunpack.i.h.bf16 %v2030_v49  ;;  %v2031_v51 = vunpack.i.l.bf16 %v2030_v49  ;;  %1179 = vrot.lane.b32.xlu2 %v2631_v13, %s2179_s4  ;;  %s2934_s4 = smov 40  }
 0xb5a   :  { %1118 = vmatpush.msra.mxu1 %v2031_v51  ;;  %1144 = vmatpush.msrb.mxu0 %v2032_v50 }
 0xb5f   :  { %v1232_v52 = vpop.permute.xlu1 %1231 }
 0xb60   :  { %1285 = vrot.lane.b32.xlu2 %v2623_v12, %s2932_s28  ;;  %1445 = vrot.lane.b32.xlu0 %v2631_v13, %s2933_s12 }
 0xb61   :  { %1252 = vmatpush.msra.mxu0 %v1232_v52 }
 0xb67   :  { %v1420_v1 = vpop.permute.xlu1 %1419 }
 0xb68   :  { %1313 = vrot.lane.b32.xlu2 %v2631_v13, %s2932_s28 }
 0xb6f   :  { %v1448_v7 = vpop.permute.xlu1 %1447 }
 0xb70   :  { %1417 = vrot.lane.b32.xlu2 %v2623_v12, %s2933_s12 }
 0xbb3   :  { %v1089_v56 = vpop.xlane.xlu2 %1088 }
 0xbb4   :  { %2104 = vrcp.f32 %v1089_v56 }
 0xbb7   :  { %v1092_v18 = vpop.xlane.xlu0 %1091 }
 0xbb8   :  { %2106 = vrcp.f32 %v1092_v18 }
 0xbba   :  { %v2105_v10 = vpop.eup %2104 }
 0xbbb   :  { %v1095_v57 = vmul.f32 %v2105_v10, %v2099_v40  ;;  %v1180_v60 = vpop.permute.xlu2 %1179 }
 0xbbc   :  { %1947 = vmatpush.xpose.msk.msrb.mxu1 %vm173_vm2, %v1180_v60 }
 0xbbd   :  { %1943 = vmatmul.msk.f32.vlgmr.msra.gmra.mxu1 %vm173_vm2, %v1095_v57 }
 0xbbe   :  { %v2107_v61 = vpop.eup %2106 }
 0xbbf   :  { %v1096_v62 = vmul.f32 %v2107_v61, %v2101_v44  ;;  %v1223_v0 = vpop.xlane.xlu0 %1222 }
 0xbc0   :  { %2108 = vrcp.f32 %v1223_v0 }
 0xbc1   :  { %1944 = vmatmul.msk.f32.vlgmr.msrb.gmra.mxu0 %vm173_vm2, %v1096_v62 }
 0xbc3   :  { %v1286_v2 = vpop.permute.xlu2 %1285 }
 0xbc4   :  { %1951 = vmatpush.xpose.msk.msra.mxu1 %vm173_vm2, %v1286_v2 }
 0xbc5   :  { %1948 = vmatmul.msk.f32.vlgmr.msrb.gmra.mxu1 %vm173_vm2, %v1178_v53 }
 0xbc6   :  { %v2109_v3 = vpop.eup %2108 }
 0xbc7   :  { %v1229_v4 = vmul.f32 %v2109_v3, %v2103_v47 }
 0xbc8   :  { %1957 = vmatpush.xpose.msk.msrb.mxu1 %vm173_vm2, %v1420_v1 }
 0xbc9   :  { %1949 = vmatmul.msk.f32.vlgmr.msra.gmra.mxu0 %vm173_vm2, %v1229_v4 }
 0xbcb   :  { %v1314_v5 = vpop.permute.xlu2 %1313 }
 0xbcc   :  { %1953 = vmatpush.xpose.msk.msrb.mxu0 %vm173_vm2, %v1314_v5 }
 0xbcd   :  { %1952 = vmatmul.msk.f32.vlgmr.msra.gmra.mxu1 %vm173_vm2, %v1284_v54 }
 0xbd0   :  { %1959 = vmatpush.xpose.msk.msra.mxu0 %vm173_vm2, %v1448_v7 }
 0xbd1   :  { %1954 = vmatmul.msk.f32.vlgmr.msrb.gmra.mxu0 %vm173_vm2, %v1312_v55 }
 0xbd2   :  { %v1446_v11 = vpop.permute.xlu0 %1445 }
 0xbd3   :  { %v1418_v8 = vpop.permute.xlu2 %1417 }
 0xbd5   :  { %1958 = vmatmul.msk.f32.vlgmr.msrb.gmra.mxu1 %vm173_vm2, %v1418_v8 }
 0xbd9   :  { %1960 = vmatmul.msk.f32.vlgmr.msra.gmra.mxu0 %vm173_vm2, %v1446_v11 }
 0xc3a   :  { %v2693_v14 = vpop.f32.mrf.mxu1 }
 0xc3e   :  { %v2695_v15 = vpop.f32.mrf.mxu0 }
 0xc42   :  { %v1202_v16 = vpop.f32.mrf.mxu1 }
 0xc43   :  { %v1206_v17 = vmul.f32 0.35355338, %v1202_v16 }
 0xc45   :  { %v1208_v19 = vadd.f32 %v1206_v17, %v2408_v59 }
 0xc46   :  { %v1254_v21 = vpop.f32.mrf.mxu0 }
 0xc47   :  { %v1212_v22 = vsel %vm173_vm2, %v1208_v19, -inf }
 0xc48   :  { %1213 = vmax.xlane.f32.xlu2 %v1212_v22 }
 0xc4a   :  { %v1308_v23 = vpop.f32.mrf.mxu1 }
 0xc4b   :  { %v1339_v63 = vmul.f32 0.35355338, %v1308_v23 }
 0xc4d   :  { %v1341_v24 = vadd.f32 %v1339_v63, %v2389_v36 }
 0xc4e   :  { %v1336_v25 = vpop.f32.mrf.mxu0 }
 0xc4f   :  { %v1340_v26 = vmul.f32 0.35355338, %v1336_v25  ;;  %v1343_v27 = vsel %vm173_vm2, %v1341_v24, -inf }
 0xc50   :  { %1344 = vmax.xlane.f32.xlu1 %v1343_v27 }
 0xc51   :  { %v1342_v28 = vadd.f32 %v1340_v26, %v2408_v59 }
 0xc52   :  { %v1442_v29 = vpop.f32.mrf.mxu1 }
 0xc53   :  { %v1473_v20 = vmul.f32 0.35355338, %v1442_v29  ;;  %v1346_v33 = vsel %vm173_vm2, %v1342_v28, -inf }
 0xc54   :  { %1347 = vmax.xlane.f32.xlu0 %v1346_v33 }
 0xc55   :  { %v1475_v34 = vadd.f32 %v1473_v20, %v2389_v36 }
 0xc56   :  { %v1470_v35 = vpop.f32.mrf.mxu0 }
 0xc57   :  { %v1474_v37 = vmul.f32 0.35355338, %v1470_v35  ;;  %v1477_v38 = vsel %vm173_vm2, %v1475_v34, -inf  ;;  %v1965_v35 = vld [vmem:[%s2890_s7 + $0x30] sm:$0xff] }
 0xc58   :  { %1478 = vmax.xlane.f32.xlu2 %v1477_v38  ;;  %v1963_v38 = vld [vmem:[%s2890_s7 + $0x20] sm:$0xff] }
 0xc59   :  { %v1476_v39 = vadd.f32 %v1474_v37, %v2408_v59  ;;  %v1964_v37 = vld [vmem:[%s2890_s7 + $0x28] sm:$0xff] }
 0xc5b   :  { %v1480_v40 = vsel %vm173_vm2, %v1476_v39, -inf }
 0xc5c   :  { %1481 = vmax.xlane.f32.xlu1 %v1480_v40 }
 0xc75   :  { %1257 = vrot.lane.b32.xlu1 %v2631_v13, %s2188_s2  ;;  %s2937_s2 = smov 16  }
 0xc7d   :  { %1525 = vrot.lane.b32.xlu1 %v2631_v13, %s2934_s4 }
 0xcbb   :  { %v1214_v41 = vpop.xlane.xlu2 %1213 }
 0xcbc   :  { %v1216_v42 = vsub.f32 %v1208_v19, %v1214_v41 }
 0xcbe   :  { %v1219_v43 = vmul.f32 1.442695, %v1216_v42 }
 0xcc0   :  { %2110 = vpow2.f32 %v1219_v43 }
 0xcc3   :  { %v1345_v36 = vpop.xlane.xlu1 %1344 }
 0xcc4   :  { %v1349_v44 = vsub.f32 %v1341_v24, %v1345_v36 }
 0xcc6   :  { %v2111_v45 = vpop.eup %2110  ;;  %v1351_v46 = vmul.f32 1.442695, %v1349_v44 }
 0xcc7   :  { %v1348_v47 = vpop.xlane.xlu0 %1347  ;;  %v1224_v59 = vsel %vm173_vm2, %v2111_v45, 0.0 }
 0xcc8   :  { %2112 = vpow2.f32 %v1351_v46  ;;  %v1350_v48 = vsub.f32 %v1342_v28, %v1348_v47  ;;  %1225 = vadd.xlane.f32.xlu0 %v1224_v59 }
 0xcca   :  { %v1353_v49 = vmul.f32 1.442695, %v1350_v48 }
 0xccb   :  { %v1479_v50 = vpop.xlane.xlu2 %1478 }
 0xccc   :  { %2114 = vpow2.f32 %v1353_v49  ;;  %v1483_v51 = vsub.f32 %v1475_v34, %v1479_v50  ;;  %v1966_v34 = vld [vmem:[%s2890_s7 + $0x38] sm:$0xff]  ;;  %s1887_s7 = sshll.u32 %s2196_s3, 4  ;;  %s1888_s7 = int_to_ptr.vmem [resolvable:$true] %s1887_s7 }
 0xccd   :  { %1609 = vmatpush.msra.mxu1 %v1966_v34 }
 0xcce   :  { %v2113_v52 = vpop.eup %2112  ;;  %v1485_v13 = vmul.f32 1.442695, %v1483_v51 }
 0xccf   :  { %v1482_v53 = vpop.xlane.xlu1 %1481  ;;  %v1355_v54 = vsel %vm173_vm2, %v2113_v52, 0.0  ;;  %1610 = vmatpush.msra.mxu1 %v1965_v35  ;;  %v2049_v35 = vld [vmem:[%s2892_s9 + $0x1] ss:$0 sm:$0xff] }
 0xcd0   :  { %2116 = vpow2.f32 %v1485_v13  ;;  %v1484_v55 = vsub.f32 %v1476_v39, %v1482_v53  ;;  %1356 = vadd.xlane.f32.xlu2 %v1355_v54 }
 0xcd1   :  { %1611 = vmatpush.msra.mxu1 %v1964_v37  ;;  %v1985_v37 = vld [vmem:[%s2896_s13 + $0xb0] sm:$0xff] }
 0xcd2   :  { %v2115_v56 = vpop.eup %2114  ;;  %v1487_v18 = vmul.f32 1.442695, %v1484_v55 }
 0xcd3   :  { %v1358_v10 = vsel %vm173_vm2, %v2115_v56, 0.0  ;;  %1612 = vmatpush.msra.mxu1 %v1963_v38 }
 0xcd4   :  { %1359 = vadd.xlane.f32.xlu0 %v1358_v10  ;;  %2118 = vpow2.f32 %v1487_v18 }
 0xcd6   :  { %v2117_v57 = vpop.eup %2116 }
 0xcd7   :  { %v1489_v60 = vsel %vm173_vm2, %v2117_v57, 0.0 }
 0xcd8   :  { %1490 = vadd.xlane.f32.xlu2 %v1489_v60 }
 0xcda   :  { %v2119_v61 = vpop.eup %2118 }
 0xcdb   :  { %v1492_v62 = vsel %vm173_vm2, %v2119_v61, 0.0 }
 0xce0   :  { %1493 = vadd.xlane.f32.xlu2 %v1492_v62 }
 0xce7   :  { %v1258_v0 = vpop.permute.xlu1 %1257 }
 0xce8   :  { %1278 = vmatpush.msrb.mxu2 %v1258_v0  ;;  %2034 = vrot.lane.b32.xlu0 %v2655_v32, %s2935_s29  ;;  %v1975_v0 = vld [vmem:[%s2894_s11 + $0x38] sm:$0xff] }
 0xce9   :  { %1708 = vmatpush.msrb.mxu0 %v1975_v0 }
 0xcef   :  { %v1526_v22 = vpop.permute.xlu1 %1525 }
 0xcf0   :  { %1553 = vrot.lane.b32.xlu0 %v1254_v21, %s2936_s30 }
 0xcf8   :  { %1499 = vrot.lane.b32.xlu2 %v2623_v12, %s2934_s4 }
 0xd3b   :  { %v1226_v1 = vpop.xlane.xlu0 %1225 }
 0xd3c   :  { %2120 = vrcp.f32 %v1226_v1  ;;  %v1974_v1 = vld [vmem:[%s2894_s11 + $0x30] sm:$0xff] }
 0xd3d   :  { %1709 = vmatpush.msrb.mxu0 %v1974_v1 }
 0xd42   :  { %v2121_v2 = vpop.eup %2120 }
 0xd43   :  { %v1230_v3 = vmul.f32 %v2121_v2, %v2111_v45  ;;  %v1357_v4 = vpop.xlane.xlu2 %1356  ;;  %v1973_v2 = vld [vmem:[%s2894_s11 + $0x28] sm:$0xff] }
 0xd44   :  { %2122 = vrcp.f32 %v1357_v4  ;;  %1710 = vmatpush.msrb.mxu0 %v1973_v2 }
 0xd45   :  { %1950 = vmatmul.msk.f32.vlgmr.msrb.gmra.mxu2 %vm173_vm2, %v1230_v3  ;;  %v1972_v3 = vld [vmem:[%s2894_s11 + $0x20] sm:$0xff] }
 0xd46   :  { %1711 = vmatpush.msrb.mxu0 %v1972_v3 }
 0xd47   :  { %v1360_v7 = vpop.xlane.xlu0 %1359 }
 0xd48   :  { %2124 = vrcp.f32 %v1360_v7 }
 0xd4a   :  { %v2123_v11 = vpop.eup %2122 }
 0xd4b   :  { %v1491_v5 = vpop.xlane.xlu2 %1490  ;;  %v1363_v12 = vmul.f32 %v2123_v11, %v2113_v52  ;;  %v1993_v11 = vld [vmem:[%s2896_s13 + $0xf0] sm:$0xff] }
 0xd4c   :  { %2126 = vrcp.f32 %v1491_v5 }
 0xd4e   :  { %v2125_v16 = vpop.eup %2124 }
 0xd4f   :  { %v1364_v21 = vmul.f32 %v2125_v16, %v2115_v56  ;;  %v1992_v16 = vld [vmem:[%s2896_s13 + $0xe8] sm:$0xff] }
 0xd52   :  { %v2127_v63 = vpop.eup %2126 }
 0xd53   :  { %v1494_v8 = vpop.xlane.xlu2 %1493  ;;  %v1497_v25 = vmul.f32 %v2127_v63, %v2117_v57  ;;  %v1989_v63 = vld [vmem:[%s2896_s13 + $0xd0] sm:$0xff] }
 0xd54   :  { %2128 = vrcp.f32 %v1494_v8  ;;  %v1994_v8 = vld [vmem:[%s2896_s13 + $0xf8] sm:$0xff] }
 0xd5a   :  { %v2035_v32 = vpop.permute.xlu0 %2034  ;;  %v2129_v24 = vpop.eup %2128 }
 0xd5b   :  { %v2037_v17 = vunpack.i.h.bf16 %v2035_v32  ;;  %v2036_v19 = vunpack.i.l.bf16 %v2035_v32  ;;  %v1500_v23 = vpop.permute.xlu2 %1499  ;;  %v1498_v26 = vmul.f32 %v2129_v24, %v2119_v61 }
 0xd5d   :  { %1386 = vmatpush.msra.mxu2 %v2036_v19  ;;  %1412 = vmatpush.msra.mxu3 %v2037_v17  ;;  %v1991_v19 = vld [vmem:[%s2896_s13 + $0xe0] sm:$0xff] }
 0xd5e   :  { %1955 = vmatmul.msk.f32.vlgmr.msra.gmra.mxu2 %vm173_vm2, %v1363_v12  ;;  %1956 = vmatmul.msk.f32.vlgmr.msra.gmra.mxu3 %vm173_vm2, %v1364_v21 }
 0xd5f   :  { %1520 = vmatpush.msrb.mxu2 %v1500_v23  ;;  %1546 = vmatpush.msrb.mxu3 %v1526_v22  ;;  %v1990_v22 = vld [vmem:[%s2896_s13 + $0xd8] sm:$0xff] }
 0xd61   :  { %1743 = vmatpush.msra.mxu2 %v1994_v8 }
 0xd62   :  { %v1554_v39 = vpop.permute.xlu0 %1553 }
 0xd63   :  { %v1575_v41 = vsel %vm173_vm2, %v2693_v14, %v1554_v39  ;;  %v2048_v14 = vld [vmem:[%s2891_s8 + $0x1] ss:$0 sm:$0xff]  ;;  %1744 = vmatpush.msra.mxu2 %v1993_v11  ;;  %s1889_s8 = sshll.u32 %s2902_s19, 4  ;;  %s1890_s8 = int_to_ptr.hbm [resolvable:$true] %s1889_s8 }
 0xd65   :  { %1745 = vmatpush.msra.mxu2 %v1992_v16 }
 0xd66   :  { %1961 = vmatmul.msk.f32.vlgmr.msrb.gmra.mxu2 %vm173_vm2, %v1497_v25  ;;  %1962 = vmatmul.msk.f32.vlgmr.msrb.gmra.mxu3 %vm173_vm2, %v1498_v26  ;;  %v1988_v25 = vld [vmem:[%s2896_s13 + $0xc8] sm:$0xff] }
 0xd67   :  { %1746 = vmatpush.msra.mxu2 %v1991_v19 }
 0xd69   :  { %1747 = vmatpush.msra.mxu2 %v1990_v22 }
 0xd6b   :  { %1748 = vmatpush.msra.mxu2 %v1989_v63 }
 0xd6d   :  { %1749 = vmatpush.msra.mxu2 %v1988_v25 }
 0xdc8   :  { %v1280_v27 = vpop.f32.mrf.mxu2 }
 0xde1   :  { %v1388_v28 = vpop.f32.mrf.mxu2  ;;  %v1414_v29 = vpop.f32.mrf.mxu3 }
 0xde2   :  { %1563 = vrot.lane.b32.xlu2 %v1414_v29, %s2937_s2  ;;  %1561 = vrot.lane.b32.xlu1 %v1388_v28, %s2937_s2 }
 0xde9   :  { %v1522_v20 = vpop.f32.mrf.mxu2  ;;  %v1548_v33 = vpop.f32.mrf.mxu3 }
 0xdea   :  { %1555 = vrot.lane.b32.xlu1 %v1280_v27, %s2936_s30  ;;  %1569 = vrot.lane.b32.xlu0 %v1522_v20, %s2938_s27  ;;  %v1987_v27 = vld [vmem:[%s2896_s13 + $0xc0] sm:$0xff]  ;;  %v1986_v20 = vld [vmem:[%s2896_s13 + $0xb8] sm:$0xff] }
 0xdeb   :  { %1750 = vmatpush.msra.mxu2 %v1987_v27 }
 0xded   :  { %1751 = vmatpush.msra.mxu2 %v1986_v20 }
 0xdef   :  { %1752 = vmatpush.msra.mxu2 %v1985_v37 }
 0xdf2   :  { %1571 = vrot.lane.b32.xlu0 %v1548_v33, %s2938_s27 }
 0xe3c   :  { %v1564_v46 = vpop.permute.xlu2 %1563 }
 0xe54   :  { %v1562_v40 = vpop.permute.xlu1 %1561 }
 0xe55   :  { %v1577_v42 = vsel %vm99_vm0, %v1575_v41, %v1562_v40  ;;  %v2050_v41 = vld [vmem:[%s2893_s10 + $0x1] ss:$0 sm:$0xff] }
 0xe5c   :  { %v1570_v43 = vpop.permute.xlu0 %1569  ;;  %v1556_v44 = vpop.permute.xlu1 %1555 }
 0xe5d   :  { %v1579_v36 = vsel %vm733_vm5, %v1577_v42, %v1570_v43  ;;  %v1576_v45 = vsel %vm173_vm2, %v2695_v15, %v1556_v44  ;;  %v1984_v42 = vld [vmem:[%s2896_s13 + $0xa8] sm:$0xff]  ;;  %v1983_v44 = vld [vmem:[%s2896_s13 + $0xa0] sm:$0xff] }
 0xe5e   :  { %1968 = vmatmul.msk.f32.vlgmr.msra.gmra.mxu1 %vm140_vm1, %v1579_v36  ;;  %v1578_v59 = vsel %vm99_vm0, %v1576_v45, %v1564_v46  ;;  %1753 = vmatpush.msra.mxu2 %v1984_v42 }
 0xe60   :  { %1754 = vmatpush.msra.mxu2 %v1983_v44 }
 0xe64   :  { %v1572_v47 = vpop.permute.xlu0 %1571 }
 0xe65   :  { %v1580_v48 = vsel %vm733_vm5, %v1578_v59, %v1572_v47  ;;  %v1982_v47 = vld [vmem:[%s2896_s13 + $0x98] sm:$0xff] }
 0xe66   :  { %1969 = vmatmul.msk.f32.gmra.mxu1 %vm140_vm1, %v1580_v48  ;;  %1755 = vmatpush.msra.mxu2 %v1982_v47 }
 0xedb   :  { %v1614_v49 = vpop.f32.mrf.mxu1 }
 0xedc   :  { %v1615_v50 = vadd.f32 %v2048_v14, %v1614_v49 }
 0xede   :  { %v1620_v51 = vadd.f32 %v1615_v50, %v2612_v58 }
 0xee0   :  { %v1626_v52 = vsel %vm140_vm1, %v1620_v51, 0.0 }
 0xee1   :  { %1627 = vadd.xlane.f32.xlu1 %v1626_v52  ;;  %v1980_v52 = vld [vmem:[%s2896_s13 + $0x88] sm:$0xff] }
 0xee3   :  { %v1617_v15 = vpop.f32.mrf.mxu1 }
 0xee4   :  { %v1618_v13 = vadd.f32 %v2048_v14, %v1617_v15  ;;  %v1979_v15 = vld [vmem:[%s2896_s13 + $0x80] sm:$0xff] }
 0xee6   :  { %v1621_v53 = vadd.f32 %v1618_v13, %v2616_v6  ;;  %v2051_v13 = vld [vmem:[%s2930_s26 + $0x1] ss:$0 sm:$0xff] }
 0xee8   :  { %v1629_v54 = vsel %vm140_vm1, %v1621_v53, 0.0 }
 0xee9   :  { %1630 = vadd.xlane.f32.xlu2 %v1629_v54 }
 0xf54   :  { %v1628_v55 = vpop.xlane.xlu1 %1627 }
 0xf55   :  { %v1632_v56 = vmul.f32 %v1628_v55, %v2499_v9 }
 0xf57   :  { %v1634_v18 = vsub.f32 %v1620_v51, %v1632_v56  ;;  %v1981_v51 = vld [vmem:[%s2896_s13 + $0x90] sm:$0xff]  ;;  %s1899_s13 = sadd.s32 4294967295, %s2382_s21 }
 0xf58   :  { %1756 = vmatpush.msra.mxu2 %v1981_v51 }
 0xf59   :  { %v1636_v10 = vmul.f32 %v1634_v18, %v1634_v18 }
 0xf5a   :  { %1757 = vmatpush.msra.mxu2 %v1980_v52  ;;  %v1852_v52 = vld [vmem:[%s2900_s17 + $0x18] sm:$0xff] }
 0xf5b   :  { %v1638_v57 = vsel %vm140_vm1, %v1636_v10, 0.0 }
 0xf5c   :  { %1639 = vadd.xlane.f32.xlu0 %v1638_v57  ;;  %v1631_v60 = vpop.xlane.xlu2 %1630  ;;  %1758 = vmatpush.msra.mxu2 %v1979_v15  ;;  %v2052_v57 = vld [vmem:[%s2897_s14 + $0x1] ss:$0 sm:$0xff]  ;;  %s86_s14 = sadd.s32 7, %s2404_s22  ;;  %v1851_v15 = vld [vmem:[%s2900_s17 + $0x10] sm:$0xff] }
 0xf5d   :  { %v1633_v58 = vmul.f32 %v1631_v60, %v2499_v9 }
 0xf5f   :  { %v2763_v61 = vsub.f32 %v1621_v53, %v1633_v58 }
 0xf61   :  { %v1637_v62 = vmul.f32 %v2763_v61, %v2763_v61 }
 0xf63   :  { %v1641_v6 = vsel %vm140_vm1, %v1637_v62, 0.0 }
 0xf64   :  { %1642 = vadd.xlane.f32.xlu1 %v1641_v6 }
 0xfcf   :  { %v1640_v4 = vpop.xlane.xlu0 %1639 }
 0xfd0   :  { %v1644_v5 = vmul.f32 %v1640_v4, %v2499_v9 }
 0xfd2   :  { %v1646_v7 = vadd.f32 1e-05, %v1644_v5 }
 0xfd4   :  { %2130 = vrsqrt.f32 %v1646_v7  ;;  %vm1654_vm5 = vweird.f32 %v1646_v7 }
 0xfd7   :  { %v1643_v32 = vpop.xlane.xlu1 %1642 }
 0xfd8   :  { %v1645_v17 = vmul.f32 %v1643_v32, %v2499_v9 }
 0xfda   :  { %v2131_v12 = vpop.eup %2130  ;;  %v1647_v21 = vadd.f32 1e-05, %v1645_v17 }
 0xfdb   :  { %v1649_v23 = vmul.f32 %v2131_v12, %v1646_v7  ;;  %vm1655_vm2 = vweird.f32 %v2131_v12 }
 0xfdc   :  { %2132 = vrsqrt.f32 %v1647_v21  ;;  %vm1656_vm7 = vmor %vm1654_vm5, %vm1655_vm2  ;;  %vm1664_vm9 = vweird.f32 %v1647_v21 }
 0xfdd   :  { %v1650_v24 = vmul.f32 %v2131_v12, %v1649_v23 }
 0xfdf   :  { %v1651_v26 = vmul.f32 0.5, %v1650_v24 }
 0xfe1   :  { %v1652_v28 = vsub.f32 1.5, %v1651_v26 }
 0xfe2   :  { %v2133_v29 = vpop.eup %2132 }
 0xfe3   :  { %v1653_v33 = vmul.f32 %v2131_v12, %v1652_v28  ;;  %v1659_v34 = vmul.f32 %v2133_v29, %v1647_v21  ;;  %vm1665_vm8 = vweird.f32 %v2133_v29 }
 0xfe4   :  { %vm1666_vm10 = vmor %vm1664_vm9, %vm1665_vm8 }
 0xfe5   :  { %v1657_v38 = vsel %vm1656_vm7, %v2131_v12, %v1653_v33  ;;  %v1660_v39 = vmul.f32 %v2133_v29, %v1659_v34  ;;  %v80_v34 = vshrl.u32 %v69_v30, 7  ;;  %v2053_v30 = vld [vmem:[%s2898_s15 + $0x1] ss:$0 sm:$0xff] }
 0xfe6   :  { %v1668_v40 = vmul.f32 %v1657_v38, %v1634_v18 }
 0xfe7   :  { %v1661_v43 = vmul.f32 0.5, %v1660_v39  ;;  %vm81_vm13 = vcmp.eq.s32.totalorder %v80_v34, 0  ;;  %vm85_vm4 = vcmp.eq.s32.totalorder %v80_v34, 1 }
 0xfe8   :  { %v1673_v36 = vmul.f32 %v2049_v35, %v1668_v40 }
 0xfe9   :  { %v1662_v45 = vsub.f32 1.5, %v1661_v43  ;;  %v87_v43 = vstv %s86_s14 }
 0xfea   :  { %v1678_v46 = vadd.f32 %v2050_v41, %v1673_v36 }
 0xfeb   :  { %v1663_v59 = vmul.f32 %v2133_v29, %v1662_v45 }
 0xfec   :  { %1977 = vmatmul.msk.f32.vlgmr.msrb.gmra.mxu0 %vm140_vm1, %v1678_v46 }
 0xfed   :  { %v1667_v48 = vsel %vm1666_vm10, %v2133_v29, %v1663_v59  ;;  %v2054_v59 = vld [vmem:[%s2899_s16 + $0x1] ss:$0 sm:$0xff] }
 0xfee   :  { %v1669_v14 = vmul.f32 %v1667_v48, %v2763_v61 }
 0xff0   :  { %v1674_v49 = vmul.f32 %v2049_v35, %v1669_v14 }
 0xff2   :  { %v1679_v50 = vadd.f32 %v2050_v41, %v1674_v49 }
 0xff4   :  { %1978 = vmatmul.msk.f32.gmra.mxu0 %vm140_vm1, %v1679_v50 }
0x1069   :  { %v1713_v53 = vpop.f32.mrf.mxu0 }
0x106a   :  { %v1714_v54 = vadd.f32 %v2051_v13, %v1713_v53 }
0x106c   :  { %v1719_v55 = vmax.f32 %v1714_v54, 0.0  ;;  %v2055_v54 = vld [vmem:[%s2901_s18] ss:$0 sm:$0xff] }
0x106e   :  { %1759 = vmatmul.f32.vlgmr.msra.gmra.mxu2 %v1719_v55 }
0x1071   :  { %v1716_v56 = vpop.f32.mrf.mxu0 }
0x1072   :  { %v1717_v18 = vadd.f32 %v2051_v13, %v1716_v56  ;;  %v1849_v13 = vld [vmem:[%s2900_s17] sm:$0xff] }
0x1074   :  { %v1720_v10 = vmax.f32 %v1717_v18, 0.0 }
0x1076   :  { %1762 = vmatmul.f32.gmra.mxu2 %v1720_v10 }
0x10f1   :  { %v1760_v60 = vpop.f32.mrf.mxu2 }
0x10f2   :  { %v1761_v58 = vadd.f32 %v2052_v57, %v1760_v60 }
0x10f4   :  { %v1766_v61 = vadd.f32 %v1761_v58, %v1678_v46 }
0x10f6   :  { %v1772_v62 = vsel %vm140_vm1, %v1766_v61, 0.0 }
0x10f7   :  { %1773 = vadd.xlane.f32.xlu0 %v1772_v62 }
0x10f9   :  { %v1763_v6 = vpop.f32.mrf.mxu2 }
0x10fa   :  { %v1764_v0 = vadd.f32 %v2052_v57, %v1763_v6 }
0x10fc   :  { %v1767_v1 = vadd.f32 %v1764_v0, %v1679_v50  ;;  %v2195_v50 = vmov 0.0  }
0x10fe   :  { %v1775_v2 = vsel %vm140_vm1, %v1767_v1, 0.0 }
0x10ff   :  { %1776 = vadd.xlane.f32.xlu2 %v1775_v2 }
0x116a   :  { %v1774_v3 = vpop.xlane.xlu0 %1773 }
0x116b   :  { %v1778_v4 = vmul.f32 %v1774_v3, %v2499_v9 }
0x116d   :  { %v1780_v5 = vsub.f32 %v1766_v61, %v1778_v4 }
0x116f   :  { %v1782_v7 = vmul.f32 %v1780_v5, %v1780_v5 }
0x1171   :  { %v1784_v8 = vsel %vm140_vm1, %v1782_v7, 0.0 }
0x1172   :  { %1785 = vadd.xlane.f32.xlu2 %v1784_v8  ;;  %v1777_v11 = vpop.xlane.xlu2 %1776 }
0x1173   :  { %v1779_v16 = vmul.f32 %v1777_v11, %v2499_v9 }
0x1175   :  { %v1781_v32 = vsub.f32 %v1767_v1, %v1779_v16 }
0x1177   :  { %v1783_v17 = vmul.f32 %v1781_v32, %v1781_v32 }
0x1179   :  { %v1787_v19 = vsel %vm140_vm1, %v1783_v17, 0.0 }
0x117a   :  { %1788 = vadd.xlane.f32.xlu1 %v1787_v19 }
0x11e5   :  { %v1786_v12 = vpop.xlane.xlu2 %1785 }
0x11e6   :  { %v1790_v21 = vmul.f32 %v1786_v12, %v2499_v9 }
0x11e8   :  { %v1792_v22 = vadd.f32 1e-05, %v1790_v21 }
0x11ea   :  { %2134 = vrsqrt.f32 %v1792_v22  ;;  %vm1800_vm12 = vweird.f32 %v1792_v22 }
0x11ed   :  { %v1789_v23 = vpop.xlane.xlu1 %1788 }
0x11ee   :  { %v1791_v63 = vmul.f32 %v1789_v23, %v2499_v9  ;;  %v83_v9 = vstv %s1899_s13 }
0x11ef   :  { %v84_v41 = vsel %vm81_vm13, %v83_v9, 0 }
0x11f0   :  { %v2135_v24 = vpop.eup %2134  ;;  %v1793_v25 = vadd.f32 1e-05, %v1791_v63  ;;  %v88_v46 = vsel %vm85_vm4, %v87_v43, %v84_v41 }
0x11f1   :  { %v1795_v26 = vmul.f32 %v2135_v24, %v1792_v22  ;;  %vm1801_vm11 = vweird.f32 %v2135_v24  ;;  %vm89_vm2 = vcmp.eq.s32.totalorder %v2385_v31, %v88_v46  ;;  %v1850_v31 = vld [vmem:[%s2900_s17 + $0x8] sm:$0xff] }
0x11f2   :  { %2136 = vrsqrt.f32 %v1793_v25  ;;  %vm1802_vm14 = vmor %vm1800_vm12, %vm1801_vm11  ;;  %vm1810_vm3 = vweird.f32 %v1793_v25  ;;  %v90_v51 = vsel %vm89_vm2, 1.0, %v2195_v50 }
0x11f3   :  { %v1796_v27 = vmul.f32 %v2135_v24, %v1795_v26 }
0x11f5   :  { %v1797_v28 = vmul.f32 0.5, %v1796_v27 }
0x11f7   :  { %v1798_v29 = vsub.f32 1.5, %v1797_v28 }
0x11f8   :  { %v2137_v20 = vpop.eup %2136 }
0x11f9   :  { %v1805_v33 = vmul.f32 %v2137_v20, %v1793_v25  ;;  %v1799_v35 = vmul.f32 %v2135_v24, %v1798_v29  ;;  %vm1811_vm15 = vweird.f32 %v2137_v20 }
0x11fa   :  { %vm1812_vm6 = vmor %vm1810_vm3, %vm1811_vm15 }
0x11fb   :  { %v1806_v37 = vmul.f32 %v2137_v20, %v1805_v33  ;;  %v1803_v39 = vsel %vm1802_vm14, %v2135_v24, %v1799_v35 }
0x11fc   :  { %v1814_v36 = vmul.f32 %v1803_v39, %v1780_v5 }
0x11fd   :  { %v1807_v38 = vmul.f32 0.5, %v1806_v37 }
0x11fe   :  { %v1819_v48 = vmul.f32 %v2053_v30, %v1814_v36 }
0x11ff   :  { %v1808_v40 = vsub.f32 1.5, %v1807_v38 }
0x1200   :  { %v1824_v49 = vadd.f32 %v2054_v59, %v1819_v48 }
0x1201   :  { %v1809_v42 = vmul.f32 %v2137_v20, %v1808_v40 }
0x1203   :  { %v1813_v44 = vsel %vm1812_vm6, %v2137_v20, %v1809_v42 }
0x1204   :  { %v1815_v45 = vmul.f32 %v1813_v44, %v1781_v32 }
0x1206   :  { %v1820_v47 = vmul.f32 %v2053_v30, %v1815_v45 }
0x1208   :  { %v1825_v14 = vadd.f32 %v2054_v59, %v1820_v47 }
0x120a   :  { %1843 = vmatpush.msra.mxu3 %v1825_v14 }
0x120c   :  { %1844 = vmatpush.msra.mxu3 %v1824_v49 }
0x120d   :  { %1998 = vmatmul.msk.f32.vlgmr.msra.gmra.mxu3 %vm99_vm0, %v90_v51  ;;  %vm1880_vm0 = vcmask 9216  }
0x120e   :  { %1872 = vmatpush.msrb.mxu3 %v1852_v52 }
0x1210   :  { %1873 = vmatpush.msrb.mxu3 %v1851_v15 }
0x1212   :  { %1874 = vmatpush.msrb.mxu3 %v1850_v31 }
0x1214   :  { %1875 = vmatpush.msrb.mxu3 %v1849_v13 }
0x1290   :  { %v1846_v53 = vpop.f32.mrf.mxu3 }
0x1291   :  { %1999 = vmatmul.msk.f32.vlgmr.msrb.gmra.mxu3 %vm140_vm1, %v1846_v53 }
0x1314   :  { %v1877_v55 = vpop.f32.mrf.mxu3 }
0x1315   :  { %v1878_v56 = vadd.f32 %v2055_v54, %v1877_v55 }
0x1317   :  { %1881 = vst.msk [vmem:[#allocation4] sm:$0x3] %vm1880_vm0, %v1878_v56 }
0x1318   :  { %1892 = dma.vmem_to_hbm [thread:$0]  %s1888_s7, 32, %s1890_s8, [#allocation5]  }
0x1319   :  { %2176 = dma.done.wait [#allocation5], 32  }
0x131a   :  { %2177 = vsyncadd [#allocation5], 4294967264 }
0x131b   :  { %1897 = vsyncpa [#allocation5], 1 }

</bundles_post_ra>
